<compile_context>
chip_gen: v5e
topology: v5e:2x2
jax: 0.10.0
libtpu: 0.0.40
codegen_flags: <defaults>
</compile_context>

<pallas_src>
import functools

import jax
import jax.numpy as jnp
from jax import lax
from jax.experimental import pallas as pl
from jax.experimental.pallas import tpu as pltpu


# ----------------------------- helpers ---------------------------------------

def _make_divisible(v, divisor=8, min_value=None):
    if min_value is None:
        min_value = divisor
    new_v = max(min_value, int(v + divisor / 2) // divisor * divisor)
    if new_v < 0.9 * v:
        new_v += divisor
    return new_v


def _hardswish(x):
    return x * jnp.clip(x + 3.0, 0.0, 6.0) * (1.0 / 6.0)


def _hardsigmoid(x):
    return jnp.clip(x + 3.0, 0.0, 6.0) * (1.0 / 6.0)


def _is_pow2(n):
    return (n & (n - 1)) == 0


# ----------------------------- Pallas kernel ----------------------------------

def inverted_residual_kernel(x_ref, p_ref, o_ref, *, N, H, W, K, Cin, Cexp,
                             Cout, Csq, offs, use_res):
    # x_ref: (Cin,  N*H*W)  channels on sublanes, lane-dense folded batch+HW axis
    # p_ref: (Cexp, 128)    all fused parameters packed column-wise
    # o_ref: (Cout, N*H*W)
    HW = H * W
    L = N * HW
    pad = (K - 1) // 2

    # ---- parameter loads: one block per logical tensor, hoisted to entry ----
    def col(name, j=0, rows=Cexp):
        c0 = offs[name] + j
        return p_ref[:rows, c0:c0 + 1]

    def blk(name, width, rows=Cexp):
        c0 = offs[name]
        return p_ref[:rows, c0:c0 + width]

    W1 = blk("w1", Cin)                                   # (Cexp, Cin)
    b1 = col("b1")                                        # (Cexp, 1)
    wdw = [col("wdw", t) for t in range(K * K)]           # K*K x (Cexp, 1)
    bdw = col("bdw")                                      # (Cexp, 1)
    Wse1 = blk("wse1", Csq)                               # (Cexp, Csq) = fc1.w.T
    bse1 = p_ref[0:1, offs["bse1"]:offs["bse1"] + Csq]    # (1, Csq)
    Wse2 = blk("wse2", Csq)                               # (Cexp, Csq) = fc2.w
    bse2 = col("bse2")                                    # (Cexp, 1)
    W3 = blk("w3", Cexp, rows=Cout)                       # (Cout, Cexp)
    b3 = col("b3", rows=Cout)                             # (Cout, 1)

    # ---- lane -> (image, h, w) maps and masks, computed exactly once --------
    def _div(a, d):
        return (a >> (d.bit_length() - 1)) if _is_pow2(d) else a // d

    def _mod(a, d):
        return (a & (d - 1)) if _is_pow2(d) else a % d

    lane = lax.broadcasted_iota(jnp.int32, (1, L), 1)
    img_idx = _div(lane, HW)
    hw = _mod(lane, HW)
    h_idx = _div(hw, W)
    w_idx = _mod(hw, W)

    def _shift_mask(idx, d, limit):
        # valid lanes where 0 <= idx + d < limit (the other bound is trivial)
        return (idx >= -d) if d < 0 else (idx < limit - d)

    row_masks = {di: _shift_mask(h_idx, di, H)
                 for di in range(-pad, pad + 1) if di != 0}
    col_masks = {dj: _shift_mask(w_idx, dj, W)
                 for dj in range(-pad, pad + 1) if dj != 0}
    img_masks = [img_idx == n for n in range(N)]

    x = x_ref[...]                                         # (Cin, L)

    # ---- expand 1x1 conv (+folded BN) + hardswish: MXU matmul ---------------
    h = _hardswish(jnp.dot(W1, x, preferred_element_type=jnp.float32) + b1)

    # ---- depthwise KxK conv, stride 1: row shifts + column rolls + masks ----
    # TODO(synk): stride=2 / dilation>1 depthwise variants not implemented.
    acc = None
    for di in range(-pad, pad + 1):
        if di == 0:
            base = h
        else:
            base = pltpu.roll(h, (-di * W) % L, 1)         # lane p <- h[p + di*W]
            base = jnp.where(row_masks[di], base, 0.0)     # row mask once / group
        for dj in range(-pad, pad + 1):
            if dj == 0:
                tap = base
            else:
                tap = pltpu.roll(base, (-dj) % L, 1)       # lane p <- base[p + dj]
                tap = jnp.where(col_masks[dj], tap, 0.0)
            term = tap * wdw[(di + pad) * K + (dj + pad)]
            acc = term if acc is None else acc + term      # first term peeled
    h2 = _hardswish(acc + bdw)                             # (Cexp, L)

    # ---- SqueezeExcitation (per-image pooling via image masks) --------------
    inv_hw = 1.0 / HW
    scales = []
    for n in range(N):
        pooled = jnp.sum(jnp.where(img_masks[n], h2, 0.0), axis=1,
                         keepdims=True) * inv_hw                       # (Cexp, 1)
        t = jnp.maximum(jnp.sum(Wse1 * pooled, axis=0, keepdims=True) + bse1,
                        0.0)                                           # (1, Csq)
        u = jnp.sum(Wse2 * t, axis=1, keepdims=True)                   # (Cexp, 1)
        scales.append(_hardsigmoid(u + bse2))
    scale = scales[N - 1]
    for n in range(N - 1):
        scale = jnp.where(img_masks[n], scales[n], scale)
    h2 = h2 * scale

    # ---- project 1x1 conv (+folded BN), Identity activation: MXU matmul -----
    out = jnp.dot(W3, h2, preferred_element_type=jnp.float32) + b3     # (Cout, L)

    if use_res:
        out = out + x
    o_ref[...] = out


# ----------------------------- wrapper ---------------------------------------

def inverted_residual(x_nchw, packed, offs, *, K, Cin, Cexp, Cout, Csq, use_res):
    N, _, H, W = x_nchw.shape
    L = N * H * W
    # Fold batch into the lane axis: (N,Cin,H,W) -> (Cin, N*H*W).  Tiny (~16 KB)
    # device-side transpose; lanes stay a multiple of 128 (unmasked stores).
    x2 = jnp.transpose(x_nchw.astype(jnp.float32), (1, 0, 2, 3)).reshape(Cin, L)

    kernel = functools.partial(
        inverted_residual_kernel, N=N, H=H, W=W, K=K, Cin=Cin,
        Cexp=Cexp, Cout=Cout, Csq=Csq, offs=offs, use_res=use_res)

    out = pl.pallas_call(
        kernel,
        out_shape=jax.ShapeDtypeStruct((Cout, L), jnp.float32),
        grid=(1,),  # whole problem (~50 KB) in one step; fits VMEM on all gens
        in_specs=[
            pl.BlockSpec((Cin, L), lambda i: (0, 0)),
            pl.BlockSpec(packed.shape, lambda i: (0, 0)),
        ],
        out_specs=pl.BlockSpec((Cout, L), lambda i: (0, 0)),
        compiler_params=pltpu.CompilerParams(dimension_semantics=("arbitrary",)),
    )(x2, packed)

    return jnp.transpose(out.reshape(Cout, N, H, W), (1, 0, 2, 3))


# ----------------------------- params (deterministic, BN fused) ---------------

def make_params(key, Cin, Cexp, Cout, Csq, K, eps=1e-3):
    ks = jax.random.split(key, 10)

    def bn_fold(k, C):
        gamma = 1.0 + 0.1 * jax.random.normal(jax.random.fold_in(k, 0), (C,))
        beta = 0.1 * jax.random.normal(jax.random.fold_in(k, 1), (C,))
        mean = 0.1 * jax.random.normal(jax.random.fold_in(k, 2), (C,))
        var = 1.0 + 0.1 * jax.random.uniform(jax.random.fold_in(k, 3), (C,))
        scale = gamma / jnp.sqrt(var + eps)
        return scale, beta - mean * scale

    w1 = 0.2 * jax.random.normal(ks[0], (Cexp, Cin))
    s1, b1 = bn_fold(ks[1], Cexp)
    wdw = 0.2 * jax.random.normal(ks[2], (Cexp, K, K))
    s2, b2 = bn_fold(ks[3], Cexp)
    wse1 = 0.2 * jax.random.normal(ks[4], (Csq, Cexp))
    bse1 = 0.1 * jax.random.normal(ks[5], (Csq,))
    wse2 = 0.2 * jax.random.normal(ks[6], (Cexp, Csq))
    bse2 = 0.1 * jax.random.normal(ks[7], (Cexp,))
    w3 = 0.2 * jax.random.normal(ks[8], (Cout, Cexp))
    s3, b3 = bn_fold(ks[9], Cout)

    f32 = lambda a: a.astype(jnp.float32)
    return dict(
        w1=f32(w1 * s1[:, None]), b1=f32(b1),
        wdw=f32(wdw * s2[:, None, None]), bdw=f32(b2),
        wse1=f32(wse1), bse1=f32(bse1), wse2=f32(wse2), bse2=f32(bse2),
        w3=f32(w3 * s3[:, None]), b3=f32(b3),
    )


def pack_params(p, *, Cin, Cexp, Cout, Csq, K):
    """Pack all fused params into one (Cexp, 128) f32 buffer; return (buf, offsets)."""
    rows = Cexp
    entries = [
        ("w1",   p["w1"]),                         # (Cexp, Cin)
        ("b1",   p["b1"].reshape(Cexp, 1)),
        ("wdw",  p["wdw"].reshape(Cexp, K * K)),
        ("bdw",  p["bdw"].reshape(Cexp, 1)),
        ("wse1", p["wse1"].T),                     # (Cexp, Csq): [c, j] = fc1.w[j, c]
        ("bse1", p["bse1"].reshape(1, Csq)),
        ("wse2", p["wse2"]),                       # (Cexp, Csq): [c, j] = fc2.w[c, j]
        ("bse2", p["bse2"].reshape(Cexp, 1)),
        ("w3",   p["w3"]),                         # (Cout, Cexp)
        ("b3",   p["b3"].reshape(Cout, 1)),
    ]
    offs, cols, col = {}, [], 0
    for name, arr in entries:
        r, c = arr.shape
        cols.append(jnp.pad(arr.astype(jnp.float32), ((0, rows - r), (0, 0))))
        offs[name] = col
        col += c
    buf = jnp.concatenate(cols, axis=1)
    lane_cols = ((col + 127) // 128) * 128
    buf = jnp.pad(buf, ((0, 0), (0, lane_cols - col)))
    return buf, offs


# ----------------------------- pure-JAX reference ------------------------------

def reference(x, p, *, K, use_res):
    N, Cin, H, W = x.shape
    pad = (K - 1) // 2

    h = (p["w1"][None, :, :, None, None] * x[:, None, :, :, :]).sum(axis=2)
    h = _hardswish(h + p["b1"][None, :, None, None])

    hp = jnp.pad(h, ((0, 0), (0, 0), (pad, pad), (pad, pad)))
    acc = jnp.zeros_like(h)
    for ki in range(K):
        for kj in range(K):
            acc = acc + hp[:, :, ki:ki + H, kj:kj + W] \
                * p["wdw"][None, :, ki, kj, None, None]
    h2 = _hardswish(acc + p["bdw"][None, :, None, None])

    pooled = h2.mean(axis=(2, 3))                                    # (N, Cexp)
    s = jnp.maximum((pooled[:, None, :] * p["wse1"][None]).sum(-1) + p["bse1"], 0.0)
    s = _hardsigmoid((s[:, None, :] * p["wse2"][None]).sum(-1) + p["bse2"])
    h2 = h2 * s[:, :, None, None]

    out = (p["w3"][None, :, :, None, None] * h2[:, None]).sum(axis=2)
    out = out + p["b3"][None, :, None, None]
    if use_res:
        out = out + x
    return out


# ----------------------------- main -------------------------------------------

if __name__ == "__main__":
    # InvertedResidualConfig(8, 3, 24, 8, use_se=True, activation='HS',
    #                        stride=1, dilation=1, width_mult=1.0)
    Cin = _make_divisible(8 * 1.0)        # 8
    Cexp = _make_divisible(24 * 1.0)      # 24
    Cout = _make_divisible(8 * 1.0)       # 8
    Csq = _make_divisible(Cexp // 4, 8)   # 8
    K = 3
    stride = 1
    use_res = (stride == 1 and Cin == Cout)

    N, H, W = 2, 16, 16

    key = jax.random.PRNGKey(0)
    kx, kp = jax.random.split(key)
    x = jax.random.normal(kx, (N, Cin, H, W), jnp.float32)
    params = make_params(kp, Cin, Cexp, Cout, Csq, K)
    packed, offs = pack_params(params, Cin=Cin, Cexp=Cexp, Cout=Cout, Csq=Csq, K=K)

    y = inverted_residual(x, packed, offs, K=K, Cin=Cin, Cexp=Cexp, Cout=Cout,
                          Csq=Csq, use_res=use_res)
    y = jax.block_until_ready(y)

    y_ref = reference(x, params, K=K, use_res=use_res)
    assert y.shape == (N, Cout, H, W)
    # tolerance leaves headroom for MXU matmul precision / reduction-order
    # differences vs the pure-f32 broadcast-sum reference
    assert bool(jnp.allclose(y, y_ref, atol=5e-3, rtol=5e-3)), "mismatch vs JAX reference"

    print("KERNEL_OK")
</pallas_src>

<mosaic_0001>
module attributes {stable_mosaic.version = 11 : i64} {
  func.func @inverted_residual_kernel(%arg0: i32, %arg1: memref<8x512xf32, #tpu.memory_space<vmem>>, %arg2: memref<24x128xf32, #tpu.memory_space<vmem>>, %arg3: memref<8x512xf32, #tpu.memory_space<vmem>>) attributes {dimension_semantics = [#tpu.dimension_semantics<arbitrary>], iteration_bounds = array<i64: 1>, scalar_prefetch = 0 : i64, scratch_operands = 0 : i64, tpu.core_type = #tpu.core_type<tc>, window_params = [{pipeline_mode = #tpu.pipeline_mode<synchronous>, transform_indices = @transform_0, window_bounds = array<i64: 8, 512>}, {pipeline_mode = #tpu.pipeline_mode<synchronous>, transform_indices = @transform_1, window_bounds = array<i64: 24, 128>}, {pipeline_mode = #tpu.pipeline_mode<synchronous>, transform_indices = @transform_2, window_bounds = array<i64: 8, 512>}]} {
    %c0 = arith.constant 0 : index
    %c0_0 = arith.constant 0 : index
    %0 = vector.load %arg2[%c0, %c0_0] : memref<24x128xf32, #tpu.memory_space<vmem>>, vector<24x8xf32>
    %c0_1 = arith.constant 0 : index
    %c8 = arith.constant 8 : index
    %1 = vector.load %arg2[%c0_1, %c8] : memref<24x128xf32, #tpu.memory_space<vmem>>, vector<24x1xf32>
    %c0_2 = arith.constant 0 : index
    %c9 = arith.constant 9 : index
    %2 = vector.load %arg2[%c0_2, %c9] : memref<24x128xf32, #tpu.memory_space<vmem>>, vector<24x1xf32>
    %c0_3 = arith.constant 0 : index
    %c10 = arith.constant 10 : index
    %3 = vector.load %arg2[%c0_3, %c10] : memref<24x128xf32, #tpu.memory_space<vmem>>, vector<24x1xf32>
    %c0_4 = arith.constant 0 : index
    %c11 = arith.constant 11 : index
    %4 = vector.load %arg2[%c0_4, %c11] : memref<24x128xf32, #tpu.memory_space<vmem>>, vector<24x1xf32>
    %c0_5 = arith.constant 0 : index
    %c12 = arith.constant 12 : index
    %5 = vector.load %arg2[%c0_5, %c12] : memref<24x128xf32, #tpu.memory_space<vmem>>, vector<24x1xf32>
    %c0_6 = arith.constant 0 : index
    %c13 = arith.constant 13 : index
    %6 = vector.load %arg2[%c0_6, %c13] : memref<24x128xf32, #tpu.memory_space<vmem>>, vector<24x1xf32>
    %c0_7 = arith.constant 0 : index
    %c14 = arith.constant 14 : index
    %7 = vector.load %arg2[%c0_7, %c14] : memref<24x128xf32, #tpu.memory_space<vmem>>, vector<24x1xf32>
    %c0_8 = arith.constant 0 : index
    %c15 = arith.constant 15 : index
    %8 = vector.load %arg2[%c0_8, %c15] : memref<24x128xf32, #tpu.memory_space<vmem>>, vector<24x1xf32>
    %c0_9 = arith.constant 0 : index
    %c16 = arith.constant 16 : index
    %9 = vector.load %arg2[%c0_9, %c16] : memref<24x128xf32, #tpu.memory_space<vmem>>, vector<24x1xf32>
    %c0_10 = arith.constant 0 : index
    %c17 = arith.constant 17 : index
    %10 = vector.load %arg2[%c0_10, %c17] : memref<24x128xf32, #tpu.memory_space<vmem>>, vector<24x1xf32>
    %c0_11 = arith.constant 0 : index
    %c18 = arith.constant 18 : index
    %11 = vector.load %arg2[%c0_11, %c18] : memref<24x128xf32, #tpu.memory_space<vmem>>, vector<24x1xf32>
    %c0_12 = arith.constant 0 : index
    %c19 = arith.constant 19 : index
    %12 = vector.load %arg2[%c0_12, %c19] : memref<24x128xf32, #tpu.memory_space<vmem>>, vector<24x8xf32>
    %c0_13 = arith.constant 0 : index
    %c27 = arith.constant 27 : index
    %13 = vector.load %arg2[%c0_13, %c27] : memref<24x128xf32, #tpu.memory_space<vmem>>, vector<1x8xf32>
    %c0_14 = arith.constant 0 : index
    %c35 = arith.constant 35 : index
    %14 = vector.load %arg2[%c0_14, %c35] : memref<24x128xf32, #tpu.memory_space<vmem>>, vector<24x8xf32>
    %c0_15 = arith.constant 0 : index
    %c43 = arith.constant 43 : index
    %15 = vector.load %arg2[%c0_15, %c43] : memref<24x128xf32, #tpu.memory_space<vmem>>, vector<24x1xf32>
    %c0_16 = arith.constant 0 : index
    %c44 = arith.constant 44 : index
    %16 = vector.load %arg2[%c0_16, %c44] : memref<24x128xf32, #tpu.memory_space<vmem>>, vector<8x24xf32>
    %c0_17 = arith.constant 0 : index
    %c68 = arith.constant 68 : index
    %17 = vector.load %arg2[%c0_17, %c68] : memref<24x128xf32, #tpu.memory_space<vmem>>, vector<8x1xf32>
    %18 = tpu.iota {dimensions = array<i32: 1>} : vector<1x512xi32>
    %c8_i32 = arith.constant 8 : i32
    %19 = vector.broadcast %c8_i32 : i32 to vector<1x512xi32>
    %20 = arith.shrsi %18, %19 : vector<1x512xi32>
    %c255_i32 = arith.constant 255 : i32
    %21 = vector.broadcast %c255_i32 : i32 to vector<1x512xi32>
    %22 = arith.andi %18, %21 : vector<1x512xi32>
    %c4_i32 = arith.constant 4 : i32
    %23 = vector.broadcast %c4_i32 : i32 to vector<1x512xi32>
    %24 = arith.shrsi %22, %23 : vector<1x512xi32>
    %c15_i32 = arith.constant 15 : i32
    %25 = vector.broadcast %c15_i32 : i32 to vector<1x512xi32>
    %26 = arith.andi %22, %25 : vector<1x512xi32>
    %c1_i32 = arith.constant 1 : i32
    %27 = vector.broadcast %c1_i32 : i32 to vector<1x512xi32>
    %28 = arith.cmpi sge, %24, %27 : vector<1x512xi32>
    %c15_i32_18 = arith.constant 15 : i32
    %29 = vector.broadcast %c15_i32_18 : i32 to vector<1x512xi32>
    %30 = arith.cmpi slt, %24, %29 : vector<1x512xi32>
    %c1_i32_19 = arith.constant 1 : i32
    %31 = vector.broadcast %c1_i32_19 : i32 to vector<1x512xi32>
    %32 = arith.cmpi sge, %26, %31 : vector<1x512xi32>
    %c15_i32_20 = arith.constant 15 : i32
    %33 = vector.broadcast %c15_i32_20 : i32 to vector<1x512xi32>
    %34 = arith.cmpi slt, %26, %33 : vector<1x512xi32>
    %c0_i32 = arith.constant 0 : i32
    %35 = vector.broadcast %c0_i32 : i32 to vector<1x512xi32>
    %36 = arith.cmpi eq, %20, %35 : vector<1x512xi32>
    %c1_i32_21 = arith.constant 1 : i32
    %37 = vector.broadcast %c1_i32_21 : i32 to vector<1x512xi32>
    %38 = arith.cmpi eq, %20, %37 : vector<1x512xi32>
    %c0_22 = arith.constant 0 : index
    %c0_23 = arith.constant 0 : index
    %39 = vector.load %arg1[%c0_22, %c0_23] : memref<8x512xf32, #tpu.memory_space<vmem>>, vector<8x512xf32>
    %cst = arith.constant dense<0.000000e+00> : vector<24x512xf32>
    %40 = tpu.matmul %0, %39, %cst {dimension_numbers = #tpu.dot_dimension_numbers<[1], [0], [0], [1], [0, 0, 1, 1], [], []>} : vector<24x8xf32>, vector<8x512xf32>, vector<24x512xf32> -> vector<24x512xf32>
    %41 = vector.broadcast %1 : vector<24x1xf32> to vector<24x512xf32>
    %42 = arith.addf %40, %41 : vector<24x512xf32>
    %cst_24 = arith.constant 3.000000e+00 : f32
    %43 = vector.broadcast %cst_24 : f32 to vector<24x512xf32>
    %44 = arith.addf %42, %43 : vector<24x512xf32>
    %cst_25 = arith.constant 0.000000e+00 : f32
    %cst_26 = arith.constant 6.000000e+00 : f32
    %45 = vector.broadcast %cst_25 : f32 to vector<24x512xf32>
    %46 = arith.maximumf %45, %44 : vector<24x512xf32>
    %47 = vector.broadcast %cst_26 : f32 to vector<24x512xf32>
    %48 = arith.minimumf %47, %46 : vector<24x512xf32>
    %49 = arith.mulf %42, %48 : vector<24x512xf32>
    %cst_27 = arith.constant 0.166666672 : f32
    %50 = vector.broadcast %cst_27 : f32 to vector<24x512xf32>
    %51 = arith.mulf %49, %50 : vector<24x512xf32>
    %c16_i32 = arith.constant 16 : i32
    %52 = tpu.dynamic_rotate %51 by %c16_i32 dim 1 : vector<24x512xf32>, i32 -> vector<24x512xf32>
    %cst_28 = arith.constant 0.000000e+00 : f32
    %53 = vector.shape_cast %28 : vector<1x512xi1> to vector<1x512xi1>
    %54 = vector.broadcast %53 : vector<1x512xi1> to vector<24x512xi1>
    %55 = vector.broadcast %cst_28 : f32 to vector<24x512xf32>
    %56 = arith.select %54, %52, %55 : vector<24x512xi1>, vector<24x512xf32>
    %c1_i32_29 = arith.constant 1 : i32
    %57 = tpu.dynamic_rotate %56 by %c1_i32_29 dim 1 : vector<24x512xf32>, i32 -> vector<24x512xf32>
    %cst_30 = arith.constant 0.000000e+00 : f32
    %58 = vector.shape_cast %32 : vector<1x512xi1> to vector<1x512xi1>
    %59 = vector.broadcast %58 : vector<1x512xi1> to vector<24x512xi1>
    %60 = vector.broadcast %cst_30 : f32 to vector<24x512xf32>
    %61 = arith.select %59, %57, %60 : vector<24x512xi1>, vector<24x512xf32>
    %62 = vector.broadcast %2 : vector<24x1xf32> to vector<24x512xf32>
    %63 = arith.mulf %61, %62 : vector<24x512xf32>
    %64 = vector.broadcast %3 : vector<24x1xf32> to vector<24x512xf32>
    %65 = arith.mulf %56, %64 : vector<24x512xf32>
    %66 = arith.addf %63, %65 : vector<24x512xf32>
    %c511_i32 = arith.constant 511 : i32
    %67 = tpu.dynamic_rotate %56 by %c511_i32 dim 1 : vector<24x512xf32>, i32 -> vector<24x512xf32>
    %cst_31 = arith.constant 0.000000e+00 : f32
    %68 = vector.shape_cast %34 : vector<1x512xi1> to vector<1x512xi1>
    %69 = vector.broadcast %68 : vector<1x512xi1> to vector<24x512xi1>
    %70 = vector.broadcast %cst_31 : f32 to vector<24x512xf32>
    %71 = arith.select %69, %67, %70 : vector<24x512xi1>, vector<24x512xf32>
    %72 = vector.broadcast %4 : vector<24x1xf32> to vector<24x512xf32>
    %73 = arith.mulf %71, %72 : vector<24x512xf32>
    %74 = arith.addf %66, %73 : vector<24x512xf32>
    %c1_i32_32 = arith.constant 1 : i32
    %75 = tpu.dynamic_rotate %51 by %c1_i32_32 dim 1 : vector<24x512xf32>, i32 -> vector<24x512xf32>
    %cst_33 = arith.constant 0.000000e+00 : f32
    %76 = vector.shape_cast %32 : vector<1x512xi1> to vector<1x512xi1>
    %77 = vector.broadcast %76 : vector<1x512xi1> to vector<24x512xi1>
    %78 = vector.broadcast %cst_33 : f32 to vector<24x512xf32>
    %79 = arith.select %77, %75, %78 : vector<24x512xi1>, vector<24x512xf32>
    %80 = vector.broadcast %5 : vector<24x1xf32> to vector<24x512xf32>
    %81 = arith.mulf %79, %80 : vector<24x512xf32>
    %82 = arith.addf %74, %81 : vector<24x512xf32>
    %83 = vector.broadcast %6 : vector<24x1xf32> to vector<24x512xf32>
    %84 = arith.mulf %51, %83 : vector<24x512xf32>
    %85 = arith.addf %82, %84 : vector<24x512xf32>
    %c511_i32_34 = arith.constant 511 : i32
    %86 = tpu.dynamic_rotate %51 by %c511_i32_34 dim 1 : vector<24x512xf32>, i32 -> vector<24x512xf32>
    %cst_35 = arith.constant 0.000000e+00 : f32
    %87 = vector.shape_cast %34 : vector<1x512xi1> to vector<1x512xi1>
    %88 = vector.broadcast %87 : vector<1x512xi1> to vector<24x512xi1>
    %89 = vector.broadcast %cst_35 : f32 to vector<24x512xf32>
    %90 = arith.select %88, %86, %89 : vector<24x512xi1>, vector<24x512xf32>
    %91 = vector.broadcast %7 : vector<24x1xf32> to vector<24x512xf32>
    %92 = arith.mulf %90, %91 : vector<24x512xf32>
    %93 = arith.addf %85, %92 : vector<24x512xf32>
    %c496_i32 = arith.constant 496 : i32
    %94 = tpu.dynamic_rotate %51 by %c496_i32 dim 1 : vector<24x512xf32>, i32 -> vector<24x512xf32>
    %cst_36 = arith.constant 0.000000e+00 : f32
    %95 = vector.shape_cast %30 : vector<1x512xi1> to vector<1x512xi1>
    %96 = vector.broadcast %95 : vector<1x512xi1> to vector<24x512xi1>
    %97 = vector.broadcast %cst_36 : f32 to vector<24x512xf32>
    %98 = arith.select %96, %94, %97 : vector<24x512xi1>, vector<24x512xf32>
    %c1_i32_37 = arith.constant 1 : i32
    %99 = tpu.dynamic_rotate %98 by %c1_i32_37 dim 1 : vector<24x512xf32>, i32 -> vector<24x512xf32>
    %cst_38 = arith.constant 0.000000e+00 : f32
    %100 = vector.shape_cast %32 : vector<1x512xi1> to vector<1x512xi1>
    %101 = vector.broadcast %100 : vector<1x512xi1> to vector<24x512xi1>
    %102 = vector.broadcast %cst_38 : f32 to vector<24x512xf32>
    %103 = arith.select %101, %99, %102 : vector<24x512xi1>, vector<24x512xf32>
    %104 = vector.broadcast %8 : vector<24x1xf32> to vector<24x512xf32>
    %105 = arith.mulf %103, %104 : vector<24x512xf32>
    %106 = arith.addf %93, %105 : vector<24x512xf32>
    %107 = vector.broadcast %9 : vector<24x1xf32> to vector<24x512xf32>
    %108 = arith.mulf %98, %107 : vector<24x512xf32>
    %109 = arith.addf %106, %108 : vector<24x512xf32>
    %c511_i32_39 = arith.constant 511 : i32
    %110 = tpu.dynamic_rotate %98 by %c511_i32_39 dim 1 : vector<24x512xf32>, i32 -> vector<24x512xf32>
    %cst_40 = arith.constant 0.000000e+00 : f32
    %111 = vector.shape_cast %34 : vector<1x512xi1> to vector<1x512xi1>
    %112 = vector.broadcast %111 : vector<1x512xi1> to vector<24x512xi1>
    %113 = vector.broadcast %cst_40 : f32 to vector<24x512xf32>
    %114 = arith.select %112, %110, %113 : vector<24x512xi1>, vector<24x512xf32>
    %115 = vector.broadcast %10 : vector<24x1xf32> to vector<24x512xf32>
    %116 = arith.mulf %114, %115 : vector<24x512xf32>
    %117 = arith.addf %109, %116 : vector<24x512xf32>
    %118 = vector.broadcast %11 : vector<24x1xf32> to vector<24x512xf32>
    %119 = arith.addf %117, %118 : vector<24x512xf32>
    %cst_41 = arith.constant 3.000000e+00 : f32
    %120 = vector.broadcast %cst_41 : f32 to vector<24x512xf32>
    %121 = arith.addf %119, %120 : vector<24x512xf32>
    %cst_42 = arith.constant 0.000000e+00 : f32
    %cst_43 = arith.constant 6.000000e+00 : f32
    %122 = vector.broadcast %cst_42 : f32 to vector<24x512xf32>
    %123 = arith.maximumf %122, %121 : vector<24x512xf32>
    %124 = vector.broadcast %cst_43 : f32 to vector<24x512xf32>
    %125 = arith.minimumf %124, %123 : vector<24x512xf32>
    %126 = arith.mulf %119, %125 : vector<24x512xf32>
    %cst_44 = arith.constant 0.166666672 : f32
    %127 = vector.broadcast %cst_44 : f32 to vector<24x512xf32>
    %128 = arith.mulf %126, %127 : vector<24x512xf32>
    %cst_45 = arith.constant 0.000000e+00 : f32
    %129 = vector.shape_cast %36 : vector<1x512xi1> to vector<1x512xi1>
    %130 = vector.broadcast %129 : vector<1x512xi1> to vector<24x512xi1>
    %131 = vector.broadcast %cst_45 : f32 to vector<24x512xf32>
    %132 = arith.select %130, %128, %131 : vector<24x512xi1>, vector<24x512xf32>
    %cst_46 = arith.constant dense<0.000000e+00> : vector<24xf32>
    %133 = vector.multi_reduction <add>, %132, %cst_46 [1] : vector<24x512xf32> to vector<24xf32>
    %134 = vector.shape_cast %133 : vector<24xf32> to vector<24x1xf32>
    %cst_47 = arith.constant 3.906250e-03 : f32
    %135 = vector.broadcast %cst_47 : f32 to vector<24x1xf32>
    %136 = arith.mulf %134, %135 : vector<24x1xf32>
    %137 = vector.broadcast %136 : vector<24x1xf32> to vector<24x8xf32>
    %138 = arith.mulf %12, %137 : vector<24x8xf32>
    %cst_48 = arith.constant dense<0.000000e+00> : vector<8xf32>
    %139 = vector.multi_reduction <add>, %138, %cst_48 [0] : vector<24x8xf32> to vector<8xf32>
    %140 = vector.shape_cast %139 : vector<8xf32> to vector<1x8xf32>
    %141 = arith.addf %140, %13 : vector<1x8xf32>
    %cst_49 = arith.constant 0.000000e+00 : f32
    %142 = vector.broadcast %cst_49 : f32 to vector<1x8xf32>
    %143 = arith.maximumf %141, %142 : vector<1x8xf32>
    %144 = vector.broadcast %143 : vector<1x8xf32> to vector<24x8xf32>
    %145 = arith.mulf %14, %144 : vector<24x8xf32>
    %cst_50 = arith.constant dense<0.000000e+00> : vector<24xf32>
    %146 = vector.multi_reduction <add>, %145, %cst_50 [1] : vector<24x8xf32> to vector<24xf32>
    %147 = vector.shape_cast %146 : vector<24xf32> to vector<24x1xf32>
    %148 = arith.addf %147, %15 : vector<24x1xf32>
    %cst_51 = arith.constant 3.000000e+00 : f32
    %149 = vector.broadcast %cst_51 : f32 to vector<24x1xf32>
    %150 = arith.addf %148, %149 : vector<24x1xf32>
    %cst_52 = arith.constant 0.000000e+00 : f32
    %cst_53 = arith.constant 6.000000e+00 : f32
    %151 = vector.broadcast %cst_52 : f32 to vector<24x1xf32>
    %152 = arith.maximumf %151, %150 : vector<24x1xf32>
    %153 = vector.broadcast %cst_53 : f32 to vector<24x1xf32>
    %154 = arith.minimumf %153, %152 : vector<24x1xf32>
    %cst_54 = arith.constant 0.166666672 : f32
    %155 = vector.broadcast %cst_54 : f32 to vector<24x1xf32>
    %156 = arith.mulf %154, %155 : vector<24x1xf32>
    %cst_55 = arith.constant 0.000000e+00 : f32
    %157 = vector.shape_cast %38 : vector<1x512xi1> to vector<1x512xi1>
    %158 = vector.broadcast %157 : vector<1x512xi1> to vector<24x512xi1>
    %159 = vector.broadcast %cst_55 : f32 to vector<24x512xf32>
    %160 = arith.select %158, %128, %159 : vector<24x512xi1>, vector<24x512xf32>
    %cst_56 = arith.constant dense<0.000000e+00> : vector<24xf32>
    %161 = vector.multi_reduction <add>, %160, %cst_56 [1] : vector<24x512xf32> to vector<24xf32>
    %162 = vector.shape_cast %161 : vector<24xf32> to vector<24x1xf32>
    %cst_57 = arith.constant 3.906250e-03 : f32
    %163 = vector.broadcast %cst_57 : f32 to vector<24x1xf32>
    %164 = arith.mulf %162, %163 : vector<24x1xf32>
    %165 = vector.broadcast %164 : vector<24x1xf32> to vector<24x8xf32>
    %166 = arith.mulf %12, %165 : vector<24x8xf32>
    %cst_58 = arith.constant dense<0.000000e+00> : vector<8xf32>
    %167 = vector.multi_reduction <add>, %166, %cst_58 [0] : vector<24x8xf32> to vector<8xf32>
    %168 = vector.shape_cast %167 : vector<8xf32> to vector<1x8xf32>
    %169 = arith.addf %168, %13 : vector<1x8xf32>
    %cst_59 = arith.constant 0.000000e+00 : f32
    %170 = vector.broadcast %cst_59 : f32 to vector<1x8xf32>
    %171 = arith.maximumf %169, %170 : vector<1x8xf32>
    %172 = vector.broadcast %171 : vector<1x8xf32> to vector<24x8xf32>
    %173 = arith.mulf %14, %172 : vector<24x8xf32>
    %cst_60 = arith.constant dense<0.000000e+00> : vector<24xf32>
    %174 = vector.multi_reduction <add>, %173, %cst_60 [1] : vector<24x8xf32> to vector<24xf32>
    %175 = vector.shape_cast %174 : vector<24xf32> to vector<24x1xf32>
    %176 = arith.addf %175, %15 : vector<24x1xf32>
    %cst_61 = arith.constant 3.000000e+00 : f32
    %177 = vector.broadcast %cst_61 : f32 to vector<24x1xf32>
    %178 = arith.addf %176, %177 : vector<24x1xf32>
    %cst_62 = arith.constant 0.000000e+00 : f32
    %cst_63 = arith.constant 6.000000e+00 : f32
    %179 = vector.broadcast %cst_62 : f32 to vector<24x1xf32>
    %180 = arith.maximumf %179, %178 : vector<24x1xf32>
    %181 = vector.broadcast %cst_63 : f32 to vector<24x1xf32>
    %182 = arith.minimumf %181, %180 : vector<24x1xf32>
    %cst_64 = arith.constant 0.166666672 : f32
    %183 = vector.broadcast %cst_64 : f32 to vector<24x1xf32>
    %184 = arith.mulf %182, %183 : vector<24x1xf32>
    %185 = vector.shape_cast %36 : vector<1x512xi1> to vector<1x512xi1>
    %186 = vector.broadcast %185 : vector<1x512xi1> to vector<24x512xi1>
    %187 = vector.shape_cast %156 : vector<24x1xf32> to vector<24x1xf32>
    %188 = vector.broadcast %187 : vector<24x1xf32> to vector<24x512xf32>
    %189 = vector.shape_cast %184 : vector<24x1xf32> to vector<24x1xf32>
    %190 = vector.broadcast %189 : vector<24x1xf32> to vector<24x512xf32>
    %191 = arith.select %186, %188, %190 : vector<24x512xi1>, vector<24x512xf32>
    %192 = arith.mulf %128, %191 : vector<24x512xf32>
    %cst_65 = arith.constant dense<0.000000e+00> : vector<8x512xf32>
    %193 = tpu.matmul %16, %192, %cst_65 {dimension_numbers = #tpu.dot_dimension_numbers<[1], [0], [0], [1], [0, 0, 1, 1], [], []>} : vector<8x24xf32>, vector<24x512xf32>, vector<8x512xf32> -> vector<8x512xf32>
    %194 = vector.broadcast %17 : vector<8x1xf32> to vector<8x512xf32>
    %195 = arith.addf %193, %194 : vector<8x512xf32>
    %196 = arith.addf %195, %39 : vector<8x512xf32>
    %c0_66 = arith.constant 0 : index
    %c0_67 = arith.constant 0 : index
    %197 = vector.load %arg3[%c0_66, %c0_67] : memref<8x512xf32, #tpu.memory_space<vmem>>, vector<8x512xf32>
    tpu.vector_store %arg3[%c0_66, %c0_67], %196 {strides = array<i32>} : memref<8x512xf32, #tpu.memory_space<vmem>>, vector<8x512xf32>,
    return
  }
  func.func @transform_0(%arg0: i32) -> (i32, i32) {
    %c0_i32 = arith.constant 0 : i32
    %c0_i32_0 = arith.constant 0 : i32
    %c0_i32_1 = arith.constant 0 : i32
    return %c0_i32, %c0_i32_0 : i32, i32
  }
  func.func @transform_1(%arg0: i32) -> (i32, i32) {
    %c0_i32 = arith.constant 0 : i32
    %c0_i32_0 = arith.constant 0 : i32
    %c0_i32_1 = arith.constant 0 : i32
    return %c0_i32, %c0_i32_0 : i32, i32
  }
  func.func @transform_2(%arg0: i32) -> (i32, i32) {
    %c0_i32 = arith.constant 0 : i32
    %c0_i32_0 = arith.constant 0 : i32
    %c0_i32_1 = arith.constant 0 : i32
    return %c0_i32, %c0_i32_0 : i32, i32
  }
}

</mosaic_0001>

<bundles_post_ra>
// kernel: tpu_custom_call.1
= control target key start
LH: loop header
LB: loop body
LE: loop exit
PB: predicated region body
PF: predicated region fallthrough
CT: control target
= control target key end

     0   :  { %7 = vsyncpa [#allocation3], 0  ;;  %s3117_s0 = inlined_call_operand.hbm [shape: f32[8,512], index: 0, kind: input, shape index: {}]   ;;  %s3118_s1 = inlined_call_operand.hbm [shape: f32[24,128], index: 1, kind: input, shape index: {}]   ;;  %s3119_s2 = inlined_call_operand.hbm [shape: f32[8,512], index: 2, kind: output, shape index: {}]  }
   0x1   :  { %8 = vsyncpa [#allocation6], 0 }
   0x2   :  { %9 = vsyncpa [#allocation4], 0  ;;  %s15_s11 = sshll.u32 %s3117_s0, 4  ;;  %s1627_s12 = smov [#allocation2]   ;;  %s16_s11 = int_to_ptr.hbm [resolvable:$true] %s15_s11 }
   0x3   :  { %s17_s13 = sshll.u32 %s1627_s12, 4  ;;  %s25_s16 = sshll.u32 %s3118_s1, 4  ;;  %s18_s13 = int_to_ptr.vmem [resolvable:$true] %s17_s13  ;;  %s26_s16 = int_to_ptr.hbm [resolvable:$true] %s25_s16 }
   0x4   :  { %20 = dma.hbm_to_vmem [thread:$0]  %s16_s11, 512, %s18_s13, [#allocation3]  }
   0x5   :  { %s1628_s17 = smov [#allocation5]   ;;  %s1629_s19 = smov 128  }
   0x6   :  { %s27_s18 = sshll.u32 %s1628_s17, 4  ;;  %s1630_s20 = smov 8   ;;  %s28_s18 = int_to_ptr.vmem [resolvable:$true] %s27_s18 }
   0x7   :  { %33 = dma.hbm_to_vmem [thread:$0]  %s26_s16, 384, %s28_s18, [#allocation6], %s1629_s19, %s1629_s19, %s1630_s20  }
   0x8   :  { %1621 = dma.done.wait [#allocation3], 512  }
   0x9   :  { %1622 = vsyncadd [#allocation3], 4294966784 }
   0xa   :  { %1623 = dma.done.wait [#allocation6], 384  }
   0xb   :  { %1624 = vsyncadd [#allocation6], 4294966912  ;;  %v1631_v0 = vmov 8   ;;  %v1632_v1 = vmov 9   ;;  %v92_v2 = vld [vmem:[#allocation2] sm:$0xff]  ;;  %v93_v3 = vld [vmem:[#allocation2 + $0x8] sm:$0xff] }
   0xc   :  { %1510 = vset.pattern.permute.xlu0 %v1631_v0  ;;  %1514 = vset.pattern.permute.xlu2 %v1632_v1  ;;  %v94_v4 = vld [vmem:[#allocation2 + $0x10] sm:$0xff]  ;;  %vm3126_vm0 = vcmask 64512   ;;  %v95_v5 = vld [vmem:[#allocation2 + $0x18] sm:$0xff]  ;;  %v1673_v6 = vld [vmem:[#allocation5] sm:$0xff]  ;;  %v1633_v9 = vmov 10   ;;  %v1634_v10 = vmov 11  }
   0xd   :  { %1511 = vset.pattern.permute.xlu1 %v1631_v0  ;;  %133 = vmatpush.msra.mxu0 %v92_v2  ;;  %v1675_v7 = vld [vmem:[#allocation5 + $0x10] sm:$0xff]  ;;  %v1688_v8 = vld [vmem:[#allocation5 + $0x8] sm:$0xff]  ;;  %v1635_v11 = vmov 12   ;;  %v1636_v12 = vmov 13   ;;  %s1637_s0 = smov 112   ;;  %s1638_s1 = smov 16  }
   0xe   :  { %159 = vmatpush.msra.mxu1 %v93_v3  ;;  %185 = vmatpush.msra.mxu2 %v94_v4  ;;  %s1639_s21 = smov 1   ;;  %s1640_s22 = smov 127  }
   0xf   :  { %211 = vmatpush.msra.mxu3 %v95_v5  ;;  %98 = vperm.xlu0 %1510, %v1673_v6   ;;  %s1646_s23 = smov 120   ;;  %s1647_s24 = smov 93  }
  0x10   :  { %1469 = vmatmul.msk.f32.vlgmr.msra.gmra.mxu0 %vm3126_vm0, %v1673_v6  ;;  %1472 = vmatmul.msk.f32.vlgmr.msra.gmra.mxu1 %vm3126_vm0, %v1673_v6  ;;  %s1649_s25 = smov 84   ;;  %s1651_s26 = smov [#allocation7]  }
  0x11   :  { %1475 = vmatmul.msk.f32.vlgmr.msra.gmra.mxu2 %vm3126_vm0, %v1673_v6  ;;  %1478 = vmatmul.msk.f32.vlgmr.msra.gmra.mxu3 %vm3126_vm0, %v1673_v6  ;;  %s1456_s27 = sshll.u32 %s1651_s26, 4  ;;  %s1458_s30 = sshll.u32 %s3119_s2, 4  ;;  %s1457_s27 = int_to_ptr.vmem [resolvable:$true] %s1456_s27  ;;  %s1459_s30 = int_to_ptr.hbm [resolvable:$true] %s1458_s30 }
  0x12   :  { %405 = vperm.xlu2 %1514, %v1675_v7   ;;  %108 = vperm.xlu1 %1511, %v1675_v7  }
  0x17   :  { %103 = vperm.xlu0 %1510, %v1688_v8  }
  0x18   :  { %1470 = vmatmul.msk.f32.gmra.mxu0 %vm3126_vm0, %v1688_v8  ;;  %1473 = vmatmul.msk.f32.gmra.mxu1 %vm3126_vm0, %v1688_v8 }
  0x19   :  { %1476 = vmatmul.msk.f32.gmra.mxu2 %vm3126_vm0, %v1688_v8  ;;  %1479 = vmatmul.msk.f32.gmra.mxu3 %vm3126_vm0, %v1688_v8 }
  0x1a   :  { %1516 = vset.pattern.permute.xlu2 %v1633_v9  ;;  %1513 = vset.pattern.permute.xlu1 %v1632_v1 }
  0x1b   :  { %425 = vperm.xlu2 %1516, %v1688_v8   ;;  %401 = vperm.xlu1 %1513, %v1688_v8  }
  0x1f   :  { %1512 = vset.pattern.permute.xlu0 %v1632_v1 }
  0x20   :  { %1471 = vmatmul.msk.f32.gmra.mxu0 %vm3126_vm0, %v1675_v7  ;;  %397 = vperm.xlu0 %1512, %v1673_v6  }
  0x21   :  { %1477 = vmatmul.msk.f32.gmra.mxu2 %vm3126_vm0, %v1675_v7  ;;  %1480 = vmatmul.msk.f32.gmra.mxu3 %vm3126_vm0, %v1675_v7 }
  0x22   :  { %1474 = vmatmul.msk.f32.gmra.mxu1 %vm3126_vm0, %v1675_v7 }
  0x23   :  { %1519 = vset.pattern.permute.xlu2 %v1634_v10  ;;  %1515 = vset.pattern.permute.xlu1 %v1633_v9 }
  0x24   :  { %518 = vperm.xlu2 %1519, %v1688_v8   ;;  %421 = vperm.xlu1 %1515, %v1673_v6  }
  0x28   :  { %1517 = vset.pattern.permute.xlu0 %v1633_v9 }
  0x29   :  { %429 = vperm.xlu0 %1517, %v1675_v7  }
  0x2c   :  { %1521 = vset.pattern.permute.xlu2 %v1635_v11  ;;  %1518 = vset.pattern.permute.xlu1 %v1634_v10 }
  0x2d   :  { %602 = vperm.xlu2 %1521, %v1688_v8   ;;  %514 = vperm.xlu1 %1518, %v1673_v6  }
  0x31   :  { %1523 = vset.pattern.permute.xlu0 %v1636_v12 }
  0x32   :  { %638 = vperm.xlu0 %1523, %v1688_v8  }
  0x35   :  { %1522 = vset.pattern.permute.xlu2 %v1636_v12  ;;  %522 = vperm.xlu1 %1518, %v1675_v7  }
  0x36   :  { %634 = vperm.xlu2 %1522, %v1673_v6  }
  0x3d   :  { %1520 = vset.pattern.permute.xlu1 %v1635_v11 }
  0x3e   :  { %642 = vperm.xlu2 %1522, %v1675_v7   ;;  %598 = vperm.xlu1 %1520, %v1673_v6  }
  0x46   :  { %606 = vperm.xlu1 %1520, %v1675_v7  }
  0x6c   :  { %v1763_v58 = vpop.permute.xlu2 %405 }
  0x6d   :  { %3168 = vst [vmem:[#allocation14_spill] sm:$0xff] %v1763_v58 }
  0x75   :  { %v1771_v0 = vpop.permute.xlu2 %425 }
  0x76   :  { %3169 = vst [vmem:[#allocation15_spill] sm:$0xff] %v1771_v0 }
  0x81   :  { %v99_v13 = vpop.permute.xlu0 %98 }
  0x84   :  { %v109_v3 = vpop.permute.xlu1 %108 }
  0x89   :  { %v104_v35 = vpop.permute.xlu0 %103 }
  0x8d   :  { %v135_v14 = vpop.f32.mrf.mxu0  ;;  %v161_v16 = vpop.f32.mrf.mxu1 }
  0x8e   :  { %v136_v15 = vadd.f32 %v135_v14, %v99_v13  ;;  %v162_v17 = vadd.f32 %v161_v16, %v99_v13 }
  0x90   :  { %v222_v18 = vadd.f32 3.0, %v136_v15  ;;  %v223_v19 = vadd.f32 3.0, %v162_v17 }
  0x92   :  { %v234_v20 = vmax.f32 %v222_v18, 0.0  ;;  %v235_v21 = vmax.f32 %v223_v19, 0.0  ;;  %v1787_v18 = vpop.permute.xlu1 %401 }
  0x93   :  { %3172 = vst [vmem:[#allocation18_spill] sm:$0xff] %v1787_v18 }
  0x94   :  { %v246_v22 = vmin.f32 %v234_v20, 6.0  ;;  %v187_v23 = vpop.f32.mrf.mxu2  ;;  %v247_v24 = vmin.f32 %v235_v21, 6.0  ;;  %v213_v26 = vpop.f32.mrf.mxu3 }
  0x95   :  { %v188_v25 = vadd.f32 %v187_v23, %v99_v13  ;;  %v214_v28 = vadd.f32 %v213_v26, %v99_v13  ;;  %v138_v34 = vpop.f32.mrf.mxu0  ;;  %v164_v42 = vpop.f32.mrf.mxu1 }
  0x96   :  { %v258_v27 = vmul.f32 %v246_v22, %v136_v15  ;;  %v259_v29 = vmul.f32 %v247_v24, %v162_v17  ;;  %v139_v37 = vadd.f32 %v138_v34, %v104_v35  ;;  %v165_v45 = vadd.f32 %v164_v42, %v104_v35  ;;  %v1779_v13 = vpop.permute.xlu2 %518 }
  0x97   :  { %v225_v31 = vadd.f32 3.0, %v214_v28  ;;  %v224_v33 = vadd.f32 3.0, %v188_v25  ;;  %3170 = vst [vmem:[#allocation16_spill] sm:$0xff] %v1779_v13 }
  0x98   :  { %v1721_v30 = vmul.f32 0.16666667, %v258_v27  ;;  %v1723_v32 = vmul.f32 0.16666667, %v259_v29  ;;  %v226_v40 = vadd.f32 3.0, %v139_v37  ;;  %v227_v49 = vadd.f32 3.0, %v165_v45 }
  0x99   :  { %v237_v36 = vmax.f32 %v225_v31, 0.0  ;;  %v236_v38 = vmax.f32 %v224_v33, 0.0 }
  0x9a   :  { %753 = vrot.lane.b32.xlu2 %v1721_v30, %s1637_s0  ;;  %282 = vrot.lane.b32.xlu1 %v1721_v30, %s1638_s1  ;;  %v238_v44 = vmax.f32 %v226_v40, 0.0  ;;  %v239_v52 = vmax.f32 %v227_v49, 0.0  ;;  %v1827_v49 = vpop.permute.xlu0 %397 }
  0x9b   :  { %288 = vrot.lane.b32.xlu0 %v1723_v32, %s1638_s1  ;;  %v249_v39 = vmin.f32 %v237_v36, 6.0  ;;  %v248_v41 = vmin.f32 %v236_v38, 6.0 }
  0x9c   :  { %v250_v48 = vmin.f32 %v238_v44, 6.0  ;;  %v251_v54 = vmin.f32 %v239_v52, 6.0  ;;  %v216_v57 = vpop.f32.mrf.mxu3  ;;  %v190_v61 = vpop.f32.mrf.mxu2 }
  0x9d   :  { %v261_v43 = vmul.f32 %v249_v39, %v214_v28  ;;  %v260_v46 = vmul.f32 %v248_v41, %v188_v25  ;;  %v217_v59 = vadd.f32 %v216_v57, %v104_v35  ;;  %v191_v62 = vadd.f32 %v190_v61, %v104_v35  ;;  %v141_v4 = vpop.f32.mrf.mxu0  ;;  %v1801_v28 = vpop.permute.xlu1 %421 }
  0x9e   :  { %v262_v51 = vmul.f32 %v250_v48, %v139_v37  ;;  %v263_v55 = vmul.f32 %v251_v54, %v165_v45  ;;  %v142_v11 = vadd.f32 %v141_v4, %v109_v3  ;;  %v1793_v25 = vpop.permute.xlu2 %602 }
  0x9f   :  { %v1737_v47 = vmul.f32 0.16666667, %v261_v43  ;;  %v1739_v50 = vmul.f32 0.16666667, %v260_v46  ;;  %v229_v60 = vadd.f32 3.0, %v217_v59  ;;  %v228_v1 = vadd.f32 3.0, %v191_v62  ;;  %v167_v5 = vpop.f32.mrf.mxu1 }
  0xa0   :  { %v1747_v53 = vmul.f32 0.16666667, %v262_v51  ;;  %v1755_v56 = vmul.f32 0.16666667, %v263_v55  ;;  %v168_v12 = vadd.f32 %v167_v5, %v109_v3  ;;  %v230_v16 = vadd.f32 3.0, %v142_v11  ;;  %3174 = vst [vmem:[#allocation20_spill] sm:$0xff] %v1793_v25 }
  0xa1   :  { %3165 = vst [vmem:[#allocation11_spill] sm:$0xff] %v1737_v47  ;;  %v241_v63 = vmax.f32 %v229_v60, 0.0  ;;  %v240_v9 = vmax.f32 %v228_v1, 0.0  ;;  %v1641_v46 = vmov 14  }
  0xa2   :  { %555 = vrot.lane.b32.xlu2 %v1723_v32, %s1639_s21  ;;  %759 = vrot.lane.b32.xlu1 %v1723_v32, %s1637_s0  ;;  %3166 = vst [vmem:[#allocation12_spill] sm:$0xff] %v1747_v53  ;;  %v231_v17 = vadd.f32 3.0, %v168_v12  ;;  %v242_v20 = vmax.f32 %v230_v16, 0.0  ;;  %v1847_v60 = vpop.permute.xlu0 %429 }
  0xa3   :  { %549 = vrot.lane.b32.xlu0 %v1721_v30, %s1639_s21  ;;  %3167 = vst [vmem:[#allocation13_spill] sm:$0xff] %v1755_v56  ;;  %v253_v2 = vmin.f32 %v241_v63, 6.0  ;;  %v252_v14 = vmin.f32 %v240_v9, 6.0  ;;  %1524 = vset.pattern.permute.xlu2 %v1641_v46  ;;  %v47_v63 = vlaneseq }
  0xa4   :  { %v243_v21 = vmax.f32 %v231_v17, 0.0  ;;  %v254_v23 = vmin.f32 %v242_v20, 6.0  ;;  %v193_v26 = vpop.f32.mrf.mxu2  ;;  %v219_v36 = vpop.f32.mrf.mxu3  ;;  %1525 = vset.pattern.permute.xlu0 %v1641_v46  ;;  %3181 = vst [vmem:[#allocation27_spill] sm:$0xff] %v1847_v60 }
  0xa5   :  { %v265_v10 = vmul.f32 %v253_v2, %v217_v59  ;;  %v264_v19 = vmul.f32 %v252_v14, %v191_v62  ;;  %v194_v31 = vadd.f32 %v193_v26, %v109_v3  ;;  %v220_v39 = vadd.f32 %v219_v36, %v109_v3  ;;  %v1815_v40 = vpop.permute.xlu1 %514 }
  0xa6   :  { %v255_v24 = vmin.f32 %v243_v21, 6.0  ;;  %v266_v27 = vmul.f32 %v254_v23, %v142_v11  ;;  %v1813_v37 = vpop.permute.xlu2 %634  ;;  %v1865_v3 = vand.u32 127, %v47_v63 }
  0xa7   :  { %v1781_v15 = vmul.f32 0.16666667, %v265_v10  ;;  %v1791_v22 = vmul.f32 0.16666667, %v264_v19  ;;  %v232_v35 = vadd.f32 3.0, %v194_v31  ;;  %v233_v42 = vadd.f32 3.0, %v220_v39 }
  0xa8   :  { %v267_v29 = vmul.f32 %v255_v24, %v168_v12  ;;  %v1803_v33 = vmul.f32 0.16666667, %v266_v27  ;;  %v1872_v4 = vadd.s32 128, %v1865_v3  ;;  %v56_v12 = vand.u32 255, %v1865_v3 }
  0xa9   :  { %3171 = vst [vmem:[#allocation17_spill] sm:$0xff] %v1781_v15  ;;  %v244_v38 = vmax.f32 %v232_v35, 0.0  ;;  %v245_v45 = vmax.f32 %v233_v42, 0.0  ;;  %vm363_vm1 = vcmp.lt.s32.totalorder %v1865_v3, 1  ;;  %vm777_vm3 = vcmp.lt.s32.totalorder %v1865_v3, 112 }
  0xaa   :  { %771 = vrot.lane.b32.xlu2 %v1737_v47, %s1637_s0  ;;  %669 = vrot.lane.b32.xlu1 %v1721_v30, %s1640_s22  ;;  %3173 = vst [vmem:[#allocation19_spill] sm:$0xff] %v1791_v22  ;;  %v1805_v34 = vmul.f32 0.16666667, %v267_v29  ;;  %v1863_v2 = vpop.permute.xlu0 %638  ;;  %v57_v11 = vand.u32 255, %v1872_v4  ;;  %v1886_v16 = vshra.s32 %v56_v12, 4  ;;  %vm306_vm5 = vcmp.lt.s32.totalorder %v1865_v3, 16 }
  0xab   :  { %294 = vrot.lane.b32.xlu0 %v1739_v50, %s1638_s1  ;;  %3175 = vst [vmem:[#allocation21_spill] sm:$0xff] %v1803_v33  ;;  %v256_v41 = vmin.f32 %v244_v38, 6.0  ;;  %v257_v52 = vmin.f32 %v245_v45, 6.0  ;;  %v1922_v38 = vand.u32 15, %v56_v12  ;;  %vm480_vm7 = vcmp.lt.s32.totalorder %v1865_v3, 127 }
  0xac   :  { %3176 = vst [vmem:[#allocation22_spill] sm:$0xff] %v1805_v34  ;;  %v1880_v14 = vand.u32 15, %v57_v11  ;;  %vm3139_vm4 = vcmp.lt.s32.totalorder %v1886_v16, 15  ;;  %v1913_v27 = vshra.s32 %v57_v11, 4  ;;  %vm68_vm9 = vcmp.ge.s32.totalorder %v1886_v16, 1 }
  0xad   :  { %v268_v44 = vmul.f32 %v256_v41, %v194_v31  ;;  %v1825_v48 = vpop.permute.xlu1 %522  ;;  %v269_v55 = vmul.f32 %v257_v52, %v220_v39  ;;  %3183 = vst [vmem:[#allocation29_spill] sm:$0xff] %v1863_v2  ;;  %v1933_v41 = vadd.s32 256, %v1865_v3  ;;  %vm80_vm8 = vcmp.lt.s32.totalorder %v1922_v38, 15 }
  0xae   :  { %v1823_v43 = vpop.permute.xlu2 %642  ;;  %3178 = vst [vmem:[#allocation24_spill] sm:$0xff] %v1825_v48  ;;  %vm77_vm2 = vcmp.ge.s32.totalorder %v1880_v14, 1  ;;  %vm69_vm6 = vcmp.ge.s32.totalorder %v1913_v27, 1  ;;  %vm76_vm10 = vcmp.ge.s32.totalorder %v1922_v38, 1  ;;  %vm73_vm11 = vcmp.lt.s32.totalorder %v1913_v27, 15 }
  0xaf   :  { %3177 = vst [vmem:[#allocation23_spill] sm:$0xff] %v1823_v43  ;;  %v1829_v51 = vmul.f32 0.16666667, %v268_v44  ;;  %v1839_v57 = vmul.f32 0.16666667, %v269_v55  ;;  %v58_v12 = vand.u32 255, %v1933_v41 }
  0xb0   :  { %3184 = vst [vmem:[#allocation30_spill] sm:$0xff] %v1872_v4  ;;  %vm81_vm15 = vcmp.lt.s32.totalorder %v1880_v14, 15 }
  0xb1   :  { %3179 = vst [vmem:[#allocation25_spill] sm:$0xff] %v1829_v51  ;;  %v1992_v43 = vand.u32 15, %v58_v12 }
  0xb2   :  { %284 = vrot.lane.b32.xlu2 %v1747_v53, %s1638_s1  ;;  %675 = vrot.lane.b32.xlu1 %v1723_v32, %s1640_s22  ;;  %3180 = vst [vmem:[#allocation26_spill] sm:$0xff] %v1839_v57 }
  0xb3   :  { %300 = vrot.lane.b32.xlu0 %v1737_v47, %s1638_s1  ;;  %3186 = vst [vmem:[#allocation32_spill] sm:$0xff] %v1933_v41  ;;  %vm78_vm13 = vcmp.ge.s32.totalorder %v1992_v43, 1 }
  0xb5   :  { %v1841_v59 = vpop.permute.xlu1 %598 }
  0xba   :  { %761 = vrot.lane.b32.xlu2 %v1755_v56, %s1637_s0  ;;  %567 = vrot.lane.b32.xlu1 %v1737_v47, %s1639_s21 }
  0xbb   :  { %765 = vrot.lane.b32.xlu0 %v1739_v50, %s1637_s0 }
  0xbd   :  { %v1859_v62 = vpop.permute.xlu1 %606 }
  0xbe   :  { %3182 = vst [vmem:[#allocation28_spill] sm:$0xff] %v1859_v62 }
  0xc2   :  { %671 = vrot.lane.b32.xlu2 %v1747_v53, %s1640_s22  ;;  %561 = vrot.lane.b32.xlu1 %v1739_v50, %s1639_s21 }
  0xc3   :  { %681 = vrot.lane.b32.xlu0 %v1739_v50, %s1640_s22 }
  0xca   :  { %677 = vrot.lane.b32.xlu2 %v1755_v56, %s1640_s22  ;;  %290 = vrot.lane.b32.xlu1 %v1755_v56, %s1638_s1 }
  0xcb   :  { %755 = vrot.lane.b32.xlu0 %v1747_v53, %s1637_s0 }
  0xd2   :  { %569 = vrot.lane.b32.xlu2 %v1781_v15, %s1639_s21  ;;  %551 = vrot.lane.b32.xlu1 %v1747_v53, %s1639_s21 }
  0xd3   :  { %557 = vrot.lane.b32.xlu0 %v1755_v56, %s1639_s21 }
  0xda   :  { %563 = vrot.lane.b32.xlu2 %v1791_v22, %s1639_s21  ;;  %296 = vrot.lane.b32.xlu1 %v1791_v22, %s1638_s1 }
  0xdb   :  { %773 = vrot.lane.b32.xlu0 %v1781_v15, %s1637_s0 }
  0xe2   :  { %286 = vrot.lane.b32.xlu2 %v1803_v33, %s1638_s1  ;;  %302 = vrot.lane.b32.xlu1 %v1781_v15, %s1638_s1 }
  0xe3   :  { %559 = vrot.lane.b32.xlu0 %v1805_v34, %s1639_s21 }
  0xea   :  { %292 = vrot.lane.b32.xlu2 %v1805_v34, %s1638_s1  ;;  %767 = vrot.lane.b32.xlu1 %v1791_v22, %s1637_s0 }
  0xeb   :  { %673 = vrot.lane.b32.xlu0 %v1803_v33, %s1640_s22 }
  0xf2   :  { %763 = vrot.lane.b32.xlu2 %v1805_v34, %s1637_s0  ;;  %683 = vrot.lane.b32.xlu1 %v1791_v22, %s1640_s22 }
  0xf3   :  { %769 = vrot.lane.b32.xlu0 %v1829_v51, %s1637_s0 }
  0xf4   :  { %v1837_v54 = vpop.permute.xlu2 %753 }
  0xfa   :  { %553 = vrot.lane.b32.xlu2 %v1803_v33, %s1639_s21  ;;  %757 = vrot.lane.b32.xlu1 %v1803_v33, %s1637_s0 }
  0xfb   :  { %571 = vrot.lane.b32.xlu0 %v1839_v57, %s1639_s21 }
  0xfc   :  { %v1851_v61 = vpop.permute.xlu2 %555 }
 0x102   :  { %298 = vrot.lane.b32.xlu2 %v1829_v51, %s1638_s1  ;;  %679 = vrot.lane.b32.xlu1 %v1805_v34, %s1640_s22 }
 0x103   :  { %565 = vrot.lane.b32.xlu0 %v1829_v51, %s1639_s21 }
 0x104   :  { %v1861_v1 = vpop.permute.xlu2 %771 }
 0x10a   :  { %304 = vrot.lane.b32.xlu2 %v1839_v57, %s1638_s1  ;;  %775 = vrot.lane.b32.xlu1 %v1839_v57, %s1637_s0 }
 0x10b   :  { %687 = vrot.lane.b32.xlu0 %v1737_v47, %s1640_s22 }
 0x10c   :  { %v1876_v5 = vpop.permute.xlu2 %284  ;;  %v283_v9 = vpop.permute.xlu1 %282 }
 0x10d   :  { %v289_v10 = vpop.permute.xlu0 %288 }
 0x10e   :  { %v313_v36 = vsel %vm306_vm5, %v283_v9, %v289_v10 }
 0x10f   :  { %v1930_v39 = vsel %vm69_vm6, %v313_v36, 0.0 }
 0x112   :  { %685 = vrot.lane.b32.xlu2 %v1829_v51, %s1640_s22  ;;  %689 = vrot.lane.b32.xlu1 %v1781_v15, %s1640_s22 }
 0x113   :  { %722 = vperm.xlu0 %1525, %v1688_v8  }
 0x114   :  { %v1891_v17 = vpop.permute.xlu2 %761  ;;  %v760_v19 = vpop.permute.xlu1 %759 }
 0x115   :  { %v550_v20 = vpop.permute.xlu0 %549  ;;  %v784_v23 = vsel %vm777_vm3, %v1837_v54, %v760_v19 }
 0x116   :  { %v579_v21 = vsel %vm363_vm1, %v550_v20, %v1851_v61  ;;  %v1907_v26 = vsel %vm3139_vm4, %v784_v23, 0.0  ;;  %v1966_v23 = vadd.s32 384, %v1865_v3 }
 0x117   :  { %v1903_v24 = vsel %vm77_vm2, %v579_v21, 0.0  ;;  %3185 = vst [vmem:[#allocation31_spill] sm:$0xff] %v1907_v26 }
 0x118   :  { %3187 = vst [vmem:[#allocation33_spill] sm:$0xff] %v1966_v23  ;;  %v59_v41 = vand.u32 255, %v1966_v23 }
 0x11a   :  { %718 = vperm.xlu2 %1524, %v1673_v6   ;;  %810 = vrot.lane.b32.xlu1 %v1907_v26, %s1639_s21 }
 0x11b   :  { %726 = vperm.xlu0 %1525, %v1675_v7  }
 0x11c   :  { %v1916_v29 = vpop.permute.xlu2 %671  ;;  %v1918_v31 = vpop.permute.xlu1 %669 }
 0x11d   :  { %v295_v35 = vpop.permute.xlu0 %294 }
 0x11e   :  { %v310_v4 = vsel %vm306_vm5, %v289_v10, %v295_v35 }
 0x122   :  { %691 = vrot.lane.b32.xlu2 %v1839_v57, %s1640_s22 }
 0x123   :  { %345 = vrot.lane.b32.xlu0 %v1930_v39, %s1639_s21 }
 0x124   :  { %v1938_v42 = vpop.permute.xlu2 %677  ;;  %v676_v44 = vpop.permute.xlu1 %675 }
 0x125   :  { %v301_v45 = vpop.permute.xlu0 %300  ;;  %v700_v46 = vsel %vm480_vm7, %v1916_v29, %v1938_v42  ;;  %v699_v52 = vsel %vm480_vm7, %v1918_v31, %v676_v44 }
 0x126   :  { %v316_v55 = vsel %vm306_vm5, %v301_v45, %v283_v9  ;;  %v1952_v63 = vsel %vm80_vm8, %v700_v46, 0.0  ;;  %v1956_v11 = vsel %vm80_vm8, %v699_v52, 0.0  ;;  %v1970_v9 = vshra.s32 %v58_v12, 4 }
 0x127   :  { %v1961_v21 = vsel %vm68_vm9, %v316_v55, 0.0 }
 0x128   :  { %456 = vrot.lane.b32.xlu1 %v1961_v21, %s1640_s22  ;;  %vm70_vm12 = vcmp.ge.s32.totalorder %v1970_v9, 1 }
 0x129   :  { %v2000_v10 = vsel %vm70_vm12, %v310_v4, 0.0  ;;  %v307_v4 = vsel %vm306_vm5, %v295_v35, %v301_v45 }
 0x12a   :  { %462 = vrot.lane.b32.xlu2 %v1930_v39, %s1640_s22 }
 0x12b   :  { %339 = vrot.lane.b32.xlu0 %v1961_v21, %s1639_s21 }
 0x12c   :  { %v570_v36 = vpop.permute.xlu2 %569  ;;  %v568_v46 = vpop.permute.xlu1 %567 }
 0x12d   :  { %v766_v52 = vpop.permute.xlu0 %765  ;;  %v582_v55 = vsel %vm363_vm1, %v568_v46, %v550_v20  ;;  %v1994_v20 = vand.u32 15, %v59_v41 }
 0x12e   :  { %v781_v34 = vsel %vm777_vm3, %v760_v19, %v766_v52  ;;  %v1985_v51 = vsel %vm76_vm10, %v582_v55, 0.0  ;;  %v2004_v19 = vshra.s32 %v59_v41, 4  ;;  %v778_v56 = vsel %vm777_vm3, %v766_v52, %v1861_v1 }
 0x12f   :  { %v1990_v57 = vsel %vm73_vm11, %v781_v34, 0.0  ;;  %vm3132_vm14 = vcmp.ge.s32.totalorder %v1994_v20, 1  ;;  %v1642_v52 = vmov 15  }
 0x130   :  { %3188 = vst [vmem:[#allocation34_spill] sm:$0xff] %v1990_v57  ;;  %816 = vrot.lane.b32.xlu1 %v1990_v57, %s1639_s21  ;;  %vm71_vm0 = vcmp.ge.s32.totalorder %v2004_v19, 1  ;;  %1526 = vset.pattern.permute.xlu0 %v1642_v52 }
 0x131   :  { %1527 = vset.pattern.permute.xlu1 %v1642_v52 }
 0x132   :  { %468 = vrot.lane.b32.xlu2 %v2000_v10, %s1640_s22 }
 0x133   :  { %351 = vrot.lane.b32.xlu0 %v2000_v10, %s1639_s21 }
 0x134   :  { %v564_v34 = vpop.permute.xlu2 %563  ;;  %v562_v12 = vpop.permute.xlu1 %561 }
 0x135   :  { %v2014_v55 = vpop.permute.xlu0 %681  ;;  %v574_v41 = vsel %vm363_vm1, %v564_v34, %v570_v36  ;;  %v573_v23 = vsel %vm363_vm1, %v562_v12, %v568_v46  ;;  %v576_v33 = vsel %vm363_vm1, %v1851_v61, %v562_v12  ;;  %v2044_v61 = vsel %vm71_vm0, %v307_v4, 0.0 }
 0x136   :  { %v696_v62 = vsel %vm480_vm7, %v676_v44, %v2014_v55  ;;  %v2028_v48 = vsel %vm3132_vm14, %v574_v41, 0.0  ;;  %v2032_v35 = vsel %vm78_vm13, %v576_v33, 0.0  ;;  %v2036_v45 = vsel %vm3132_vm14, %v573_v23, 0.0 }
 0x137   :  { %3189 = vst [vmem:[#allocation35_spill] sm:$0xff] %v2028_v48  ;;  %v2040_v46 = vsel %vm81_vm15, %v696_v62, 0.0  ;;  %v787_v41 = vsel %vm777_vm3, %v1861_v1, %v1837_v54  ;;  %vm75_vm14 = vcmp.lt.s32.totalorder %v2004_v19, 15 }
 0x13a   :  { %474 = vrot.lane.b32.xlu2 %v2044_v61, %s1640_s22 }
 0x13b   :  { %357 = vrot.lane.b32.xlu0 %v2044_v61, %s1639_s21 }
 0x13c   :  { %v2050_v33 = vpop.permute.xlu2 %286  ;;  %v291_v44 = vpop.permute.xlu1 %290 }
 0x13d   :  { %v2052_v12 = vpop.permute.xlu0 %755  ;;  %v314_v62 = vsel %vm306_vm5, %v1876_v5, %v291_v44 }
 0x13e   :  { %v785_v23 = vsel %vm777_vm3, %v2052_v12, %v1891_v17  ;;  %v2063_v4 = vsel %vm69_vm6, %v314_v62, 0.0  ;;  %v2080_v62 = vsel %vm75_vm14, %v787_v41, 0.0 }
 0x13f   :  { %3190 = vst [vmem:[#allocation36_spill] sm:$0xff] %v2063_v4  ;;  %347 = vrot.lane.b32.xlu1 %v2063_v4, %s1639_s21  ;;  %v2074_v15 = vsel %vm3139_vm4, %v785_v23, 0.0  ;;  %vm74_vm4 = vcmp.lt.s32.totalorder %v1970_v9, 15 }
 0x142   :  { %812 = vrot.lane.b32.xlu2 %v2074_v15, %s1639_s21 }
 0x143   :  { %828 = vrot.lane.b32.xlu0 %v2080_v62, %s1639_s21 }
 0x144   :  { %v2084_v54 = vpop.permute.xlu2 %292  ;;  %v552_v53 = vpop.permute.xlu1 %551 }
 0x145   :  { %v558_v48 = vpop.permute.xlu0 %557  ;;  %v583_v22 = vsel %vm363_vm1, %v570_v36, %v552_v53 }
 0x146   :  { %v577_v23 = vsel %vm363_vm1, %v558_v48, %v564_v34  ;;  %v580_v2 = vsel %vm363_vm1, %v552_v53, %v558_v48  ;;  %v2094_v41 = vsel %vm76_vm10, %v583_v22, 0.0  ;;  %v2110_v53 = vsel %vm74_vm4, %v778_v56, 0.0 }
 0x147   :  { %3191 = vst [vmem:[#allocation37_spill] sm:$0xff] %v2094_v41  ;;  %v2101_v25 = vsel %vm78_vm13, %v577_v23, 0.0  ;;  %v2105_v36 = vsel %vm77_vm2, %v580_v2, 0.0 }
 0x148   :  { %3192 = vst [vmem:[#allocation38_spill] sm:$0xff] %v2101_v25 }
 0x149   :  { %3193 = vst [vmem:[#allocation39_spill] sm:$0xff] %v2105_v36 }
 0x14a   :  { %3194 = vst [vmem:[#allocation40_spill] sm:$0xff] %v2110_v53 }
 0x14b   :  { %822 = vrot.lane.b32.xlu0 %v2110_v53, %s1639_s21 }
 0x14c   :  { %v2114_v22 = vpop.permute.xlu2 %763  ;;  %v297_v48 = vpop.permute.xlu1 %296 }
 0x14d   :  { %v774_v1 = vpop.permute.xlu0 %773  ;;  %v311_v52 = vsel %vm306_vm5, %v291_v44, %v297_v48 }
 0x14e   :  { %v2139_v13 = vsel %vm70_vm12, %v311_v52, 0.0 }
 0x14f   :  { %3197 = vst [vmem:[#allocation43_spill] sm:$0xff] %v2139_v13 }
 0x153   :  { %464 = vrot.lane.b32.xlu0 %v2063_v4, %s1640_s22 }
 0x154   :  { %v554_v2 = vpop.permute.xlu2 %553  ;;  %v303_v34 = vpop.permute.xlu1 %302 }
 0x155   :  { %v560_v23 = vpop.permute.xlu0 %559  ;;  %v317_v56 = vsel %vm306_vm5, %v303_v34, %v1876_v5  ;;  %v1643_v5 = vmov 16  }
 0x156   :  { %v581_v41 = vsel %vm363_vm1, %v554_v2, %v560_v23  ;;  %v2125_v25 = vsel %vm68_vm9, %v317_v56, 0.0  ;;  %1528 = vset.pattern.permute.xlu2 %v1643_v5 }
 0x157   :  { %3195 = vst [vmem:[#allocation41_spill] sm:$0xff] %v2125_v25  ;;  %v2131_v36 = vsel %vm77_vm2, %v581_v41, 0.0  ;;  %458 = vrot.lane.b32.xlu2 %v2125_v25, %s1640_s22  ;;  %341 = vrot.lane.b32.xlu1 %v2125_v25, %s1639_s21  ;;  %v308_v25 = vsel %vm306_vm5, %v297_v48, %v303_v34 }
 0x158   :  { %3196 = vst [vmem:[#allocation42_spill] sm:$0xff] %v2131_v36  ;;  %v2158_v52 = vsel %vm71_vm0, %v308_v25, 0.0 }
 0x159   :  { %3199 = vst [vmem:[#allocation45_spill] sm:$0xff] %v2158_v52 }
 0x15b   :  { %470 = vrot.lane.b32.xlu0 %v2139_v13, %s1640_s22 }
 0x15c   :  { %v299_v44 = vpop.permute.xlu2 %298  ;;  %v768_v56 = vpop.permute.xlu1 %767 }
 0x15d   :  { %v674_v18 = vpop.permute.xlu0 %673  ;;  %v782_v41 = vsel %vm777_vm3, %v1891_v17, %v768_v56  ;;  %v315_v17 = vsel %vm306_vm5, %v2050_v33, %v2084_v54 }
 0x15e   :  { %v2148_v36 = vsel %vm73_vm11, %v782_v41, 0.0  ;;  %v2180_v58 = vsel %vm69_vm6, %v315_v17, 0.0  ;;  %vm83_vm6 = vcmp.lt.s32.totalorder %v1994_v20, 15 }
 0x15f   :  { %3198 = vst [vmem:[#allocation44_spill] sm:$0xff] %v2148_v36  ;;  %353 = vrot.lane.b32.xlu1 %v2139_v13, %s1639_s21  ;;  %818 = vrot.lane.b32.xlu2 %v2148_v36, %s1639_s21 }
 0x163   :  { %476 = vrot.lane.b32.xlu0 %v2158_v52, %s1640_s22 }
 0x164   :  { %v305_v41 = vpop.permute.xlu2 %304  ;;  %v2166_v48 = vpop.permute.xlu1 %683 }
 0x165   :  { %v2168_v34 = vpop.permute.xlu0 %769  ;;  %v697_v13 = vsel %vm480_vm7, %v1938_v42, %v2166_v48  ;;  %v309_v60 = vsel %vm306_vm5, %v299_v44, %v305_v41  ;;  %v318_v17 = vsel %vm306_vm5, %v305_v41, %v2050_v33  ;;  %v779_v41 = vsel %vm777_vm3, %v768_v56, %v774_v1 }
 0x166   :  { %v2176_v25 = vsel %vm81_vm15, %v697_v13, 0.0  ;;  %v2190_v42 = vsel %vm71_vm0, %v309_v60, 0.0  ;;  %v788_v13 = vsel %vm777_vm3, %v774_v1, %v2052_v12  ;;  %v2210_v12 = vsel %vm68_vm9, %v318_v17, 0.0 }
 0x167   :  { %359 = vrot.lane.b32.xlu1 %v2158_v52, %s1639_s21  ;;  %349 = vrot.lane.b32.xlu2 %v2180_v58, %s1639_s21  ;;  %v2206_v60 = vsel %vm75_vm14, %v788_v13, 0.0  ;;  %vm3204_vm0 = vcmp.ge.s32.totalorder %v1994_v20, 1  ;;  %vm3206_vm9 = vcmp.lt.s32.totalorder %v1886_v16, 15 }
 0x168   :  { %3200 = vst [vmem:[#allocation46_spill] sm:$0xff] %v2206_v60 }
 0x16b   :  { %478 = vrot.lane.b32.xlu0 %v2190_v42, %s1640_s22 }
 0x16c   :  { %v686_v0 = vpop.permute.xlu2 %685  ;;  %v2200_v52 = vpop.permute.xlu1 %757 }
 0x16d   :  { %v572_v4 = vpop.permute.xlu0 %571 }
 0x16e   :  { %v584_v57 = vsel %vm363_vm1, %v572_v4, %v554_v2  ;;  %v312_v2 = vsel %vm306_vm5, %v2084_v54, %v299_v44  ;;  %vm82_vm5 = vcmp.lt.s32.totalorder %v1992_v43, 15 }
 0x16f   :  { %v2214_v33 = vsel %vm76_vm10, %v584_v57, 0.0  ;;  %830 = vrot.lane.b32.xlu1 %v2206_v60, %s1639_s21  ;;  %343 = vrot.lane.b32.xlu2 %v2210_v12, %s1639_s21  ;;  %v2228_v57 = vsel %vm70_vm12, %v312_v2, 0.0  ;;  %vm3233_vm12 = vmmov %vm3204_vm0 }
 0x170   :  { %3201 = vst [vmem:[#allocation47_spill] sm:$0xff] %v2214_v33  ;;  %v2232_v33 = vsel %vm74_vm4, %v779_v41, 0.0 }
 0x171   :  { %3202 = vst [vmem:[#allocation48_spill] sm:$0xff] %v2232_v33 }
 0x173   :  { %859 = vperm.xlu0 %1526, %v1673_v6  }
 0x174   :  { %v719_v13 = vpop.permute.xlu2 %718  ;;  %v680_v17 = vpop.permute.xlu1 %679 }
 0x175   :  { %v566_v60 = vpop.permute.xlu0 %565  ;;  %v2235_v47 = vmul.f32 %v719_v13, %v1956_v11  ;;  %v2238_v54 = vmul.f32 %v719_v13, %v2040_v46  ;;  %v698_v1 = vsel %vm480_vm7, %v680_v17, %v686_v0  ;;  %v701_v44 = vsel %vm480_vm7, %v674_v18, %v680_v17 }
 0x176   :  { %v575_v56 = vsel %vm363_vm1, %v566_v60, %v572_v4  ;;  %v578_v2 = vsel %vm363_vm1, %v560_v23, %v566_v60  ;;  %v713_v41 = vsel %vm80_vm8, %v701_v44, 0.0  ;;  %v714_v11 = vsel %vm81_vm15, %v698_v1, 0.0 }
 0x177   :  { %3203 = vst [vmem:[#allocation49_spill] sm:$0xff] %v2235_v47  ;;  %v2254_v46 = vsel %vm78_vm13, %v578_v2, 0.0  ;;  %v2258_v47 = vsel %vm3204_vm0, %v575_v56, 0.0  ;;  %355 = vrot.lane.b32.xlu2 %v2228_v57, %s1639_s21  ;;  %824 = vrot.lane.b32.xlu1 %v2232_v33, %s1639_s21 }
 0x17b   :  { %1529 = vset.pattern.permute.xlu0 %v1643_v5 }
 0x17c   :  { %899 = vperm.xlu0 %1529, %v1688_v8   ;;  %v692_v4 = vpop.permute.xlu2 %691  ;;  %v776_v23 = vpop.permute.xlu1 %775 }
 0x17d   :  { %v688_v60 = vpop.permute.xlu0 %687  ;;  %v695_v17 = vsel %vm480_vm7, %v686_v0, %v692_v4  ;;  %v704_v1 = vsel %vm480_vm7, %v692_v4, %v674_v18  ;;  %v783_v4 = vsel %vm777_vm3, %v2114_v22, %v2168_v34 }
 0x17e   :  { %v693_v44 = vsel %vm480_vm7, %v2014_v55, %v688_v60  ;;  %v702_v5 = vsel %vm480_vm7, %v688_v60, %v1918_v31  ;;  %v715_v56 = vsel %vm82_vm5, %v695_v17, 0.0  ;;  %v716_v2 = vsel %vm83_vm6, %v704_v1, 0.0 }
 0x17f   :  { %v707_v0 = vsel %vm82_vm5, %v693_v44, 0.0  ;;  %v708_v18 = vsel %vm83_vm6, %v702_v5, 0.0  ;;  %361 = vrot.lane.b32.xlu2 %v2190_v42, %s1639_s21  ;;  %466 = vrot.lane.b32.xlu1 %v2180_v58, %s1640_s22  ;;  %v786_v60 = vsel %vm777_vm3, %v2200_v52, %v2114_v22 }
 0x180   :  { %v2289_v55 = vmul.f32 %v719_v13, %v707_v0  ;;  %v2291_v31 = vmul.f32 %v719_v13, %v708_v18  ;;  %v2311_v0 = vsel %vm73_vm11, %v783_v4, 0.0  ;;  %v2315_v22 = vsel %vm3206_vm9, %v786_v60, 0.0  ;;  %vm3232_vm11 = vmmov %vm3204_vm0 }
 0x181   :  { %3205 = vst [vmem:[#allocation50_spill] sm:$0xff] %v2311_v0  ;;  %v3155_v18 = vmov 17   ;;  %vm3280_vm9 = vcmask 64512  }
 0x182   :  { %3207 = vst [vmem:[#allocation51_spill] sm:$0xff] %v2315_v22 }
 0x184   :  { %942 = vrot.lane.b32.xlu0 %v2110_v53, %s1640_s22  ;;  %v463_v17 = vpop.permute.xlu2 %462  ;;  %v690_v1 = vpop.permute.xlu1 %689 }
 0x185   :  { %v723_v44 = vpop.permute.xlu0 %722  ;;  %v694_v13 = vsel %vm480_vm7, %v2166_v48, %v690_v1  ;;  %v703_v5 = vsel %vm480_vm7, %v690_v1, %v1916_v29  ;;  %1531 = vset.pattern.permute.xlu0 %v3155_v18 }
 0x186   :  { %v2319_v53 = vmul.f32 %v723_v44, %v1952_v63  ;;  %v2322_v48 = vmul.f32 %v723_v44, %v2176_v25  ;;  %v711_v29 = vsel %vm82_vm5, %v694_v13, 0.0  ;;  %v712_v27 = vsel %vm83_vm6, %v703_v5, 0.0 }
 0x187   :  { %v2328_v4 = vmul.f32 %v723_v44, %v711_v29  ;;  %v2330_v16 = vmul.f32 %v723_v44, %v712_v27  ;;  %820 = vrot.lane.b32.xlu2 %v2311_v0, %s1639_s21  ;;  %814 = vrot.lane.b32.xlu1 %v2315_v22, %s1639_s21  ;;  %v789_v63 = vsel %vm777_vm3, %v776_v23, %v2200_v52 }
 0x188   :  { %v2345_v44 = vsel %vm75_vm14, %v789_v63, 0.0  ;;  %vm3240_vm14 = vmmov %vm3204_vm0 }
 0x18c   :  { %934 = vrot.lane.b32.xlu0 %v2315_v22, %s1640_s22  ;;  %v469_v25 = vpop.permute.xlu2 %468  ;;  %v2361_v19 = vpop.permute.xlu1 %810 }
 0x18d   :  { %v727_v60 = vpop.permute.xlu0 %726  ;;  %v484_v1 = vsel %vm480_vm7, %v463_v17, %v469_v25 }
 0x18e   :  { %v2347_v13 = vmul.f32 %v727_v60, %v713_v41  ;;  %v2349_v5 = vmul.f32 %v727_v60, %v714_v11  ;;  %v2351_v29 = vmul.f32 %v727_v60, %v715_v56  ;;  %v2353_v27 = vmul.f32 %v727_v60, %v716_v2 }
 0x18f   :  { %v502_v52 = vsel %vm81_vm15, %v484_v1, 0.0  ;;  %460 = vrot.lane.b32.xlu1 %v2210_v12, %s1640_s22  ;;  %832 = vrot.lane.b32.xlu2 %v2345_v44, %s1639_s21  ;;  %v780_v41 = vsel %vm777_vm3, %v2168_v34, %v776_v23  ;;  %vm3210_vm3 = vmmov %vm3204_vm0 }
 0x190   :  { %3208 = vst [vmem:[#allocation52_spill] sm:$0xff] %v2349_v5  ;;  %v2374_v60 = vsel %vm74_vm4, %v780_v41, 0.0  ;;  %v647_v5 = vmul.f32 %v1813_v37, %v1739_v50  ;;  %vm3215_vm4 = vmmov %vm3204_vm0 }
 0x191   :  { %3209 = vst [vmem:[#allocation53_spill] sm:$0xff] %v2374_v60 }
 0x194   :  { %948 = vrot.lane.b32.xlu0 %v2080_v62, %s1640_s22  ;;  %v475_v11 = vpop.permute.xlu2 %474 }
 0x195   :  { %v481_v56 = vsel %vm480_vm7, %v469_v25, %v475_v11  ;;  %v346_v2 = vpop.permute.xlu0 %345 }
 0x196   :  { %v503_v63 = vsel %vm82_vm5, %v481_v56, 0.0 }
 0x197   :  { %472 = vrot.lane.b32.xlu1 %v2228_v57, %s1640_s22  ;;  %826 = vrot.lane.b32.xlu2 %v2374_v60, %s1639_s21 }
 0x19a   :  { %v457_v34 = vpop.permute.xlu1 %456 }
 0x19b   :  { %v487_v23 = vsel %vm480_vm7, %v457_v34, %v463_v17  ;;  %v490_v25 = vsel %vm480_vm7, %v475_v11, %v457_v34  ;;  %v433_v17 = vmul.f32 %v1801_v28, %v1930_v39  ;;  %v526_v34 = vmul.f32 %v1815_v40, %v502_v52 }
 0x19c   :  { %v501_v1 = vsel %vm80_vm8, %v487_v23, 0.0  ;;  %v504_v9 = vsel %vm83_vm6, %v490_v25, 0.0  ;;  %983 = vperm.xlu0 %1531, %v1688_v8  }
 0x19d   :  { %v340_v41 = vpop.permute.xlu0 %339 }
 0x19e   :  { %v370_v56 = vsel %vm363_vm1, %v340_v41, %v346_v2 }
 0x19f   :  { %v385_v18 = vsel %vm77_vm2, %v370_v56, 0.0  ;;  %863 = vperm.xlu1 %1527, %v1688_v8   ;;  %895 = vperm.xlu2 %1528, %v1673_v6   ;;  %v610_v8 = vmul.f32 %v1841_v59, %v1903_v24  ;;  %v434_v24 = vmul.f32 %v1801_v28, %v2000_v10 }
 0x1a0   :  { %v409_v11 = vmul.f32 %v1827_v49, %v385_v18  ;;  %v646_v18 = vmul.f32 %v1813_v37, %v1723_v32  ;;  %v527_v32 = vmul.f32 %v1815_v40, %v503_v63  ;;  %v3157_v63 = vmov 18  }
 0x1a2   :  { %v445_v23 = vadd.f32 %v433_v17, %v409_v11  ;;  %v2399_v25 = vpop.permute.xlu1 %816 }
 0x1a3   :  { %v840_v22 = vsel %vm363_vm1, %v2361_v19, %v2399_v25 }
 0x1a4   :  { %v538_v56 = vadd.f32 %v526_v34, %v445_v23  ;;  %v2409_v6 = vsel %vm77_vm2, %v840_v22, 0.0  ;;  %v2423_v23 = vpop.permute.xlu2 %812  ;;  %1534 = vset.pattern.permute.xlu0 %v3157_v63 }
 0x1a5   :  { %v352_v39 = vpop.permute.xlu0 %351 }
 0x1a6   :  { %v622_v52 = vadd.f32 %v610_v8, %v538_v56  ;;  %v367_v17 = vsel %vm363_vm1, %v346_v2, %v352_v39 }
 0x1a7   :  { %v386_v11 = vsel %vm78_vm13, %v367_v17, 0.0  ;;  %867 = vperm.xlu1 %1527, %v1675_v7   ;;  %932 = vrot.lane.b32.xlu2 %v2074_v15, %s1640_s22  ;;  %v611_v7 = vmul.f32 %v1841_v59, %v2032_v35  ;;  %v435_v35 = vmul.f32 %v1801_v28, %v2044_v61  ;;  %v525_v61 = vmul.f32 %v1815_v40, %v501_v1 }
 0x1a8   :  { %v410_v22 = vmul.f32 %v1827_v49, %v386_v11  ;;  %v658_v34 = vadd.f32 %v646_v18, %v622_v52 }
 0x1aa   :  { %v446_v8 = vadd.f32 %v434_v24, %v410_v22  ;;  %v2427_v2 = vadd.f32 %v2238_v54, %v658_v34  ;;  %v432_v54 = vmul.f32 %v1801_v28, %v1961_v21  ;;  %v2452_v21 = vld [vmem:[#allocation5 + $0x10] sm:$0xff]  ;;  %v528_v22 = vmul.f32 %v1815_v40, %v504_v9 }
 0x1ab   :  { %3211 = vst [vmem:[#allocation54_spill] sm:$0xff] %v2452_v21  ;;  %1023 = vperm.xlu0 %1534, %v2452_v21  }
 0x1ac   :  { %v539_v56 = vadd.f32 %v527_v32, %v446_v8 }
 0x1ad   :  { %v358_v17 = vpop.permute.xlu0 %357 }
 0x1ae   :  { %v623_v10 = vadd.f32 %v611_v7, %v539_v56  ;;  %v364_v18 = vsel %vm363_vm1, %v352_v39, %v358_v17  ;;  %v373_v52 = vsel %vm363_vm1, %v358_v17, %v340_v41  ;;  %v612_v7 = vmul.f32 %v1841_v59, %v2036_v45 }
 0x1af   :  { %v384_v11 = vsel %vm76_vm10, %v373_v52, 0.0  ;;  %v387_v50 = vsel %vm3210_vm3, %v364_v18, 0.0  ;;  %930 = vrot.lane.b32.xlu1 %v1907_v26, %s1640_s22  ;;  %938 = vrot.lane.b32.xlu2 %v2148_v36, %s1640_s22  ;;  %vm3281_vm3 = vmmov %vm3280_vm9 }
 0x1b0   :  { %v408_v41 = vmul.f32 %v1827_v49, %v384_v11  ;;  %v411_v39 = vmul.f32 %v1827_v49, %v387_v50  ;;  %1532 = vset.pattern.permute.xlu1 %v3157_v63  ;;  %v659_v28 = vadd.f32 %v647_v5, %v623_v10  ;;  %v609_v49 = vmul.f32 %v1841_v59, %v1985_v51  ;;  %v3212_v10 = vld [vmem:[#allocation11_spill] sm:$0xff]  ;;  %v3213_v59 = vld [vmem:[#allocation34_spill] sm:$0xff] }
 0x1b1   :  { %v2457_v24 = vpop.permute.xlu2 %458  ;;  %v645_v5 = vmul.f32 %v1813_v37, %v1721_v30  ;;  %v648_v40 = vmul.f32 %v1813_v37, %v3212_v10  ;;  %v3222_v63 = vld [vmem:[#allocation46_spill] sm:$0xff] }
 0x1b2   :  { %v444_v34 = vadd.f32 %v432_v54, %v408_v41  ;;  %v447_v32 = vadd.f32 %v435_v35, %v411_v39  ;;  %v2461_v8 = vadd.f32 %v2289_v55, %v659_v28  ;;  %v3214_v54 = vld [vmem:[#allocation49_spill] sm:$0xff] }
 0x1b4   :  { %v537_v56 = vadd.f32 %v525_v61, %v444_v34  ;;  %v540_v17 = vadd.f32 %v528_v22, %v447_v32  ;;  %v3216_v61 = vmov 17   ;;  %v348_v22 = vpop.permute.xlu1 %347 }
 0x1b5   :  { %v829_v1 = vpop.permute.xlu0 %828 }
 0x1b6   :  { %v621_v9 = vadd.f32 %v609_v49, %v537_v56  ;;  %v624_v18 = vadd.f32 %v612_v7, %v540_v17  ;;  %v843_v55 = vsel %vm363_vm1, %v829_v1, %v2361_v19  ;;  %v2524_v7 = vld [vmem:[#allocation5] sm:$0xff] }
 0x1b7   :  { %v2476_v51 = vsel %vm76_vm10, %v843_v55, 0.0  ;;  %936 = vrot.lane.b32.xlu1 %v3213_v59, %s1640_s22  ;;  %903 = vperm.xlu2 %1528, %v2452_v21  }
 0x1b8   :  { %v657_v30 = vadd.f32 %v645_v5, %v621_v9  ;;  %v660_v45 = vadd.f32 %v648_v40, %v624_v18  ;;  %v3217_v9 = vld [vmem:[#allocation36_spill] sm:$0xff]  ;;  %v3218_v18 = vld [vmem:[#allocation15_spill] sm:$0xff] }
 0x1b9   :  { %v2481_v52 = vpop.permute.xlu2 %818  ;;  %v437_v55 = vmul.f32 %v3218_v18, %v3217_v9 }
 0x1ba   :  { %v841_v37 = vsel %vm363_vm1, %v2423_v23, %v2481_v52  ;;  %v2488_v19 = vadd.f32 %v3214_v54, %v657_v30  ;;  %v2491_v35 = vadd.f32 %v2291_v31, %v660_v45  ;;  %v3219_v30 = vld [vmem:[#allocation27_spill] sm:$0xff] }
 0x1bb   :  { %v2495_v11 = vsel %vm77_vm2, %v841_v37, 0.0  ;;  %v441_v45 = vmul.f32 %v3219_v30, %v2180_v58  ;;  %v3220_v37 = vld [vmem:[#allocation14_spill] sm:$0xff]  ;;  %v3223_v58 = vld [vmem:[#allocation16_spill] sm:$0xff] }
 0x1bd   :  { %v823_v50 = vpop.permute.xlu0 %822 }
 0x1be   :  { %v834_v41 = vsel %vm363_vm1, %v823_v50, %v829_v1  ;;  %v837_v39 = vsel %vm363_vm1, %v2399_v25, %v823_v50  ;;  %v3221_v50 = vld [vmem:[#allocation18_spill] sm:$0xff] }
 0x1bf   :  { %v2504_v28 = vsel %vm78_vm13, %v837_v39, 0.0  ;;  %v2508_v31 = vsel %vm3215_vm4, %v834_v41, 0.0  ;;  %944 = vrot.lane.b32.xlu1 %v2232_v33, %s1640_s22  ;;  %946 = vrot.lane.b32.xlu2 %v2374_v60, %s1640_s22  ;;  %v3225_v33 = vld [vmem:[#allocation20_spill] sm:$0xff]  ;;  %vm3282_vm4 = vmmov %vm3281_vm3 }
 0x1c0   :  { %1530 = vset.pattern.permute.xlu2 %v3216_v61 }
 0x1c1   :  { %v350_v34 = vpop.permute.xlu2 %349 }
 0x1c5   :  { %v465_v32 = vpop.permute.xlu0 %464 }
 0x1c6   :  { %v488_v25 = vsel %vm480_vm7, %v2457_v24, %v465_v32 }
 0x1c7   :  { %v2520_v49 = vsel %vm80_vm8, %v488_v25, 0.0  ;;  %940 = vrot.lane.b32.xlu1 %v2311_v0, %s1640_s22  ;;  %979 = vperm.xlu2 %1530, %v2524_v7  }
 0x1c9   :  { %v344_v56 = vpop.permute.xlu2 %343  ;;  %v342_v17 = vpop.permute.xlu1 %341 }
 0x1ca   :  { %v372_v5 = vsel %vm363_vm1, %v344_v56, %v350_v34  ;;  %v371_v1 = vsel %vm363_vm1, %v342_v17, %v348_v22 }
 0x1cb   :  { %v393_v10 = vsel %vm77_vm2, %v372_v5, 0.0  ;;  %v389_v40 = vsel %vm77_vm2, %v371_v1, 0.0 }
 0x1cc   :  { %v417_v54 = vmul.f32 %v3220_v37, %v393_v10  ;;  %v413_v41 = vmul.f32 %v3221_v50, %v389_v40  ;;  %v3224_v40 = vld [vmem:[#allocation39_spill] sm:$0xff] }
 0x1cd   :  { %v471_v39 = vpop.permute.xlu0 %470 }
 0x1ce   :  { %v2541_v61 = vadd.f32 %v441_v45, %v417_v54  ;;  %v449_v25 = vadd.f32 %v437_v55, %v413_v41  ;;  %v485_v5 = vsel %vm480_vm7, %v465_v32, %v471_v39  ;;  %v614_v45 = vmul.f32 %v3225_v33, %v3224_v40  ;;  %v3226_v41 = vld [vmem:[#allocation13_spill] sm:$0xff] }
 0x1cf   :  { %v506_v1 = vsel %vm81_vm15, %v485_v5, 0.0  ;;  %950 = vrot.lane.b32.xlu1 %v3222_v63, %s1640_s22  ;;  %987 = vperm.xlu2 %1530, %v2452_v21   ;;  %v3227_v5 = vld [vmem:[#allocation29_spill] sm:$0xff]  ;;  %v3228_v63 = vld [vmem:[#allocation43_spill] sm:$0xff] }
 0x1d0   :  { %v530_v9 = vmul.f32 %v3223_v58, %v506_v1  ;;  %v650_v0 = vmul.f32 %v3227_v5, %v3226_v41  ;;  %v438_v21 = vmul.f32 %v3218_v18, %v3228_v63 }
 0x1d1   :  { %v356_v10 = vpop.permute.xlu2 %355  ;;  %v354_v60 = vpop.permute.xlu1 %353 }
 0x1d2   :  { %v542_v54 = vadd.f32 %v530_v9, %v449_v25  ;;  %v369_v55 = vsel %vm363_vm1, %v350_v34, %v356_v10  ;;  %v368_v32 = vsel %vm363_vm1, %v348_v22, %v354_v60  ;;  %v442_v25 = vmul.f32 %v3219_v30, %v2228_v57 }
 0x1d3   :  { %v394_v1 = vsel %vm78_vm13, %v369_v55, 0.0  ;;  %v390_v36 = vsel %vm78_vm13, %v368_v32, 0.0  ;;  %v3231_v32 = vld [vmem:[#allocation38_spill] sm:$0xff] }
 0x1d4   :  { %v626_v9 = vadd.f32 %v614_v45, %v542_v54  ;;  %v418_v34 = vmul.f32 %v3220_v37, %v394_v1  ;;  %v414_v22 = vmul.f32 %v3221_v50, %v390_v36  ;;  %v3229_v45 = vmov 18  }
 0x1d5   :  { %v477_v40 = vpop.permute.xlu0 %476  ;;  %v615_v1 = vmul.f32 %v3225_v33, %v3231_v32 }
 0x1d6   :  { %v662_v59 = vadd.f32 %v650_v0, %v626_v9  ;;  %v2569_v41 = vadd.f32 %v442_v25, %v418_v34  ;;  %v450_v26 = vadd.f32 %v438_v21, %v414_v22  ;;  %v482_v63 = vsel %vm480_vm7, %v471_v39, %v477_v40  ;;  %v2584_v21 = vld [vmem:[#allocation5 + $0x8] sm:$0xff] }
 0x1d7   :  { %v491_v55 = vsel %vm480_vm7, %v477_v40, %v2457_v24  ;;  %v507_v57 = vsel %vm82_vm5, %v482_v63, 0.0  ;;  %952 = vrot.lane.b32.xlu1 %v2345_v44, %s1640_s22  ;;  %1533 = vset.pattern.permute.xlu2 %v3229_v45  ;;  %v3230_v24 = vld [vmem:[#allocation19_spill] sm:$0xff]  ;;  %v443_v25 = vmul.f32 %v3219_v30, %v2190_v42  ;;  %v440_v9 = vmul.f32 %v3219_v30, %v2210_v12 }
 0x1d8   :  { %v508_v36 = vsel %vm83_vm6, %v491_v55, 0.0  ;;  %v531_v0 = vmul.f32 %v3223_v58, %v507_v57  ;;  %1019 = vperm.xlu2 %1533, %v2584_v21   ;;  %v2588_v39 = vadd.f32 %v2322_v48, %v662_v59  ;;  %v651_v54 = vmul.f32 %v3227_v5, %v3230_v24  ;;  %v3234_v57 = vld [vmem:[#allocation41_spill] sm:$0xff] }
 0x1d9   :  { %v362_v34 = vpop.permute.xlu2 %361  ;;  %v360_v22 = vpop.permute.xlu1 %359  ;;  %v436_v45 = vmul.f32 %v3218_v18, %v3234_v57 }
 0x1da   :  { %v543_v40 = vadd.f32 %v531_v0, %v450_v26  ;;  %v366_v63 = vsel %vm363_vm1, %v356_v10, %v362_v34  ;;  %v375_v48 = vsel %vm363_vm1, %v362_v34, %v344_v56  ;;  %v365_v59 = vsel %vm363_vm1, %v354_v60, %v360_v22  ;;  %v3235_v0 = vld [vmem:[#allocation45_spill] sm:$0xff] }
 0x1db   :  { %v392_v55 = vsel %vm76_vm10, %v375_v48, 0.0  ;;  %v395_v42 = vsel %vm3232_vm11, %v366_v63, 0.0  ;;  %v374_v12 = vsel %vm363_vm1, %v360_v22, %v342_v17  ;;  %v391_v26 = vsel %vm3233_vm12, %v365_v59, 0.0  ;;  %vm3283_vm11 = vmmov %vm3281_vm3 }
 0x1dc   :  { %v627_v30 = vadd.f32 %v615_v1, %v543_v40  ;;  %v416_v10 = vmul.f32 %v3220_v37, %v392_v55  ;;  %v419_v56 = vmul.f32 %v3220_v37, %v395_v42  ;;  %v388_v60 = vsel %vm76_vm10, %v374_v12, 0.0  ;;  %vm3284_vm12 = vmmov %vm3281_vm3 }
 0x1dd   :  { %v439_v24 = vmul.f32 %v3218_v18, %v3235_v0  ;;  %v412_v32 = vmul.f32 %v3221_v50, %v388_v60  ;;  %v415_v17 = vmul.f32 %v3221_v50, %v391_v26  ;;  %v2622_v34 = vpop.permute.xlu0 %478  ;;  %v529_v37 = vmul.f32 %v3223_v58, %v2520_v49  ;;  %v3236_v50 = vld [vmem:[#allocation35_spill] sm:$0xff]  ;;  %v3238_v49 = vld [vmem:[#allocation12_spill] sm:$0xff] }
 0x1de   :  { %v663_v1 = vadd.f32 %v651_v54, %v627_v30  ;;  %v2624_v22 = vadd.f32 %v440_v9, %v416_v10  ;;  %v2626_v40 = vadd.f32 %v443_v25, %v419_v56  ;;  %v532_v63 = vmul.f32 %v3223_v58, %v508_v36  ;;  %v3237_v54 = vld [vmem:[#allocation37_spill] sm:$0xff] }
 0x1df   :  { %v448_v48 = vadd.f32 %v436_v45, %v412_v32  ;;  %v451_v59 = vadd.f32 %v439_v24, %v415_v17  ;;  %1015 = vperm.xlu1 %1532, %v2524_v7   ;;  %v616_v55 = vmul.f32 %v3225_v33, %v3236_v50  ;;  %v613_v9 = vmul.f32 %v3225_v33, %v3237_v54  ;;  %v3239_v30 = vld [vmem:[#allocation17_spill] sm:$0xff] }
 0x1e0   :  { %v2633_v18 = vadd.f32 %v2328_v4, %v663_v1  ;;  %v649_v58 = vmul.f32 %v3227_v5, %v3238_v49  ;;  %v652_v4 = vmul.f32 %v3227_v5, %v3239_v30 }
 0x1e1   :  { %v541_v25 = vadd.f32 %v529_v37, %v448_v48  ;;  %v544_v42 = vadd.f32 %v532_v63, %v451_v59  ;;  %v821_v12 = vpop.permute.xlu2 %820  ;;  %v831_v26 = vpop.permute.xlu1 %830 }
 0x1e2   :  { %v844_v36 = vsel %vm363_vm1, %v831_v26, %v2423_v23 }
 0x1e3   :  { %v625_v10 = vadd.f32 %v613_v9, %v541_v25  ;;  %v628_v56 = vadd.f32 %v616_v55, %v544_v42  ;;  %v2648_v60 = vsel %vm76_vm10, %v844_v36, 0.0 }
 0x1e5   :  { %v860_v33 = vpop.permute.xlu0 %859  ;;  %v661_v57 = vadd.f32 %v649_v58, %v625_v10  ;;  %v664_v45 = vadd.f32 %v652_v4, %v628_v56 }
 0x1e6   :  { %v870_v0 = vmul.f32 %v860_v33, %v2476_v51  ;;  %v871_v24 = vmul.f32 %v860_v33, %v2409_v6  ;;  %v872_v32 = vmul.f32 %v860_v33, %v2504_v28  ;;  %v873_v23 = vmul.f32 %v860_v33, %v2508_v31 }
 0x1e7   :  { %v2655_v17 = vadd.f32 %v2319_v53, %v661_v57  ;;  %v2658_v5 = vadd.f32 %v2330_v16, %v664_v45  ;;  %v3241_v57 = vld [vmem:[#allocation24_spill] sm:$0xff] }
 0x1e8   :  { %v2661_v1 = vadd.f32 %v870_v0, %v2488_v19  ;;  %v2664_v37 = vadd.f32 %v871_v24, %v2427_v2  ;;  %v2667_v51 = vadd.f32 %v872_v32, %v2461_v8  ;;  %v885_v6 = vadd.f32 %v873_v23, %v2491_v35  ;;  %v3242_v24 = vld [vmem:[#allocation47_spill] sm:$0xff]  ;;  %v3243_v32 = vld [vmem:[#allocation28_spill] sm:$0xff] }
 0x1e9   :  { %v833_v28 = vpop.permute.xlu2 %832  ;;  %v825_v63 = vpop.permute.xlu1 %824  ;;  %v617_v23 = vmul.f32 %v3243_v32, %v3242_v24 }
 0x1ea   :  { %v835_v53 = vsel %vm363_vm1, %v825_v63, %v831_v26  ;;  %v838_v16 = vsel %vm363_vm1, %v2481_v52, %v825_v63 }
 0x1eb   :  { %v2677_v19 = vsel %vm78_vm13, %v838_v16, 0.0  ;;  %v2681_v2 = vsel %vm3240_vm14, %v835_v53, 0.0  ;;  %v3244_v53 = vld [vmem:[#allocation21_spill] sm:$0xff]  ;;  %v3245_v16 = vld [vmem:[#allocation23_spill] sm:$0xff]  ;;  %vm3285_vm14 = vmmov %vm3281_vm3 }
 0x1ee   :  { %v2683_v8 = vpop.permute.xlu0 %899 }
 0x1f1   :  { %v827_v35 = vpop.permute.xlu2 %826  ;;  %v467_v31 = vpop.permute.xlu1 %466 }
 0x1f2   :  { %v836_v48 = vsel %vm363_vm1, %v827_v35, %v833_v28  ;;  %v839_v59 = vsel %vm363_vm1, %v821_v12, %v827_v35  ;;  %v653_v35 = vmul.f32 %v3245_v16, %v3244_v53 }
 0x1f3   :  { %v2691_v52 = vsel %vm78_vm13, %v839_v59, 0.0  ;;  %v2695_v50 = vsel %vm3204_vm0, %v836_v48, 0.0  ;;  %v3246_v48 = vld [vmem:[#allocation26_spill] sm:$0xff]  ;;  %vm1360_vm0 = vcmask 195584  }
 0x1f4   :  { %v656_v59 = vmul.f32 %v3245_v16, %v3246_v48  ;;  %v3249_v48 = vld [vmem:[#allocation22_spill] sm:$0xff] }
 0x1f6   :  { %v2697_v55 = vpop.permute.xlu0 %942 }
 0x1f9   :  { %v2699_v54 = vpop.permute.xlu2 %895  ;;  %v815_v9 = vpop.permute.xlu1 %814 }
 0x1fa   :  { %v909_v25 = vmul.f32 %v2699_v54, %v2080_v62  ;;  %v842_v42 = vsel %vm363_vm1, %v815_v9, %v821_v12  ;;  %v845_v26 = vsel %vm363_vm1, %v833_v28, %v815_v9 }
 0x1fb   :  { %v2709_v49 = vsel %vm76_vm10, %v845_v26, 0.0  ;;  %v2713_v58 = vsel %vm77_vm2, %v842_v42, 0.0 }
 0x1fc   :  { %v2715_v36 = vadd.f32 %v909_v25, %v885_v6  ;;  %v620_v6 = vmul.f32 %v3243_v32, %v2258_v47 }
 0x1fe   :  { %v2717_v30 = vpop.permute.xlu0 %934 }
 0x201   :  { %v2719_v4 = vpop.permute.xlu2 %932  ;;  %v461_v62 = vpop.permute.xlu1 %460 }
 0x202   :  { %v489_v12 = vsel %vm480_vm7, %v461_v62, %v467_v31  ;;  %v492_v10 = vsel %vm480_vm7, %v2622_v34, %v461_v62 }
 0x203   :  { %v509_v56 = vsel %vm80_vm8, %v489_v12, 0.0  ;;  %v512_v33 = vsel %vm83_vm6, %v492_v10, 0.0 }
 0x204   :  { %v533_v45 = vmul.f32 %v3241_v57, %v509_v56  ;;  %v536_v0 = vmul.f32 %v3241_v57, %v512_v33 }
 0x206   :  { %v545_v28 = vadd.f32 %v533_v45, %v2624_v22  ;;  %v548_v63 = vadd.f32 %v536_v0, %v2626_v40  ;;  %v949_v10 = vpop.permute.xlu0 %948 }
 0x208   :  { %v629_v9 = vadd.f32 %v617_v23, %v545_v28  ;;  %v632_v25 = vadd.f32 %v620_v6, %v548_v63  ;;  %v3248_v63 = vld [vmem:[#allocation25_spill] sm:$0xff] }
 0x209   :  { %v2742_v42 = vpop.permute.xlu2 %938  ;;  %v473_v26 = vpop.permute.xlu1 %472  ;;  %v655_v53 = vmul.f32 %v3245_v16, %v3248_v63 }
 0x20a   :  { %v665_v62 = vadd.f32 %v653_v35, %v629_v9  ;;  %v668_v12 = vadd.f32 %v656_v59, %v632_v25  ;;  %v483_v47 = vsel %vm480_vm7, %v473_v26, %v2622_v34  ;;  %v486_v22 = vsel %vm480_vm7, %v467_v31, %v473_v26  ;;  %v3247_v31 = vld [vmem:[#allocation42_spill] sm:$0xff] }
 0x20b   :  { %v511_v40 = vsel %vm82_vm5, %v483_v47, 0.0  ;;  %v510_v56 = vsel %vm81_vm15, %v486_v22, 0.0  ;;  %v619_v34 = vmul.f32 %v3243_v32, %v2254_v46  ;;  %v618_v6 = vmul.f32 %v3243_v32, %v3247_v31 }
 0x20c   :  { %v535_v33 = vmul.f32 %v3241_v57, %v511_v40  ;;  %v749_v45 = vadd.f32 %v2347_v13, %v665_v62  ;;  %v752_v0 = vadd.f32 %v2353_v27, %v668_v12  ;;  %v534_v24 = vmul.f32 %v3241_v57, %v510_v56  ;;  %v3250_v40 = vld [vmem:[#allocation52_spill] sm:$0xff] }
 0x20d   :  { %v654_v13 = vmul.f32 %v3245_v16, %v3249_v48  ;;  %v961_v46 = vsel %vm480_vm7, %v2719_v4, %v2742_v42  ;;  %v910_v12 = vmul.f32 %v2683_v8, %v2074_v15 }
 0x20e   :  { %v547_v23 = vadd.f32 %v535_v33, %v2569_v41  ;;  %v546_v28 = vadd.f32 %v534_v24, %v2541_v61  ;;  %v2775_v25 = vpop.permute.xlu0 %983 }
 0x210   :  { %v631_v35 = vadd.f32 %v619_v34, %v547_v23  ;;  %v630_v27 = vadd.f32 %v618_v6, %v546_v28  ;;  %v3251_v28 = vld [vmem:[#allocation40_spill] sm:$0xff] }
 0x211   :  { %v2767_v59 = vpop.permute.xlu2 %903  ;;  %v864_v57 = vpop.permute.xlu1 %863  ;;  %v908_v63 = vmul.f32 %v2699_v54, %v3251_v28 }
 0x212   :  { %v667_v9 = vadd.f32 %v655_v53, %v631_v35  ;;  %v666_v41 = vadd.f32 %v654_v13, %v630_v27  ;;  %v874_v61 = vmul.f32 %v864_v57, %v2648_v60  ;;  %v875_v32 = vmul.f32 %v864_v57, %v2495_v11 }
 0x213   :  { %v876_v26 = vmul.f32 %v864_v57, %v2677_v19  ;;  %v877_v16 = vmul.f32 %v864_v57, %v2681_v2  ;;  %v970_v11 = vsel %vm80_vm8, %v961_v46, 0.0  ;;  %v954_v53 = vsel %vm480_vm7, %v2697_v55, %v949_v10  ;;  %v3252_v57 = vld [vmem:[#allocation31_spill] sm:$0xff]  ;;  %v3253_v46 = vld [vmem:[#allocation34_spill] sm:$0xff] }
 0x214   :  { %v751_v62 = vadd.f32 %v2351_v29, %v667_v9  ;;  %v886_v47 = vadd.f32 %v874_v61, %v2655_v17  ;;  %v887_v22 = vadd.f32 %v875_v32, %v2588_v39  ;;  %v750_v56 = vadd.f32 %v3250_v40, %v666_v41 }
 0x215   :  { %v2788_v60 = vadd.f32 %v876_v26, %v2633_v18  ;;  %v2791_v19 = vadd.f32 %v877_v16, %v2658_v5  ;;  %v994_v29 = vmul.f32 %v2775_v25, %v970_v11  ;;  %v906_v9 = vmul.f32 %v2699_v54, %v3252_v57 }
 0x216   :  { %v922_v2 = vadd.f32 %v910_v12, %v886_v47  ;;  %v907_v41 = vmul.f32 %v2699_v54, %v3253_v46 }
 0x217   :  { %v918_v54 = vadd.f32 %v906_v9, %v2661_v1 }
 0x218   :  { %v1006_v17 = vadd.f32 %v994_v29, %v922_v2  ;;  %v919_v16 = vadd.f32 %v907_v41, %v2664_v37  ;;  %v3257_v41 = vld [vmem:[#allocation48_spill] sm:$0xff] }
 0x219   :  { %v2794_v33 = vpop.permute.xlu2 %946  ;;  %v868_v15 = vpop.permute.xlu1 %867 }
 0x21a   :  { %v878_v39 = vmul.f32 %v868_v15, %v2709_v49  ;;  %v879_v24 = vmul.f32 %v868_v15, %v2713_v58  ;;  %v880_v34 = vmul.f32 %v868_v15, %v2691_v52  ;;  %v881_v23 = vmul.f32 %v868_v15, %v2695_v50 }
 0x21b   :  { %v968_v49 = vsel %vm82_vm5, %v954_v53, 0.0  ;;  %v920_v50 = vadd.f32 %v908_v63, %v2667_v51  ;;  %v3256_v53 = vld [vmem:[#allocation50_spill] sm:$0xff] }
 0x21c   :  { %v890_v18 = vadd.f32 %v878_v39, %v749_v45  ;;  %v891_v31 = vadd.f32 %v879_v24, %v750_v56  ;;  %v2800_v6 = vadd.f32 %v880_v34, %v751_v62  ;;  %v2802_v5 = vadd.f32 %v881_v23, %v752_v0  ;;  %v3254_v56 = vld [vmem:[#allocation44_spill] sm:$0xff]  ;;  %v3255_v23 = vld [vmem:[#allocation51_spill] sm:$0xff] }
 0x21d   :  { %v911_v11 = vmul.f32 %v2683_v8, %v3254_v56  ;;  %v914_v28 = vmul.f32 %v2767_v59, %v3255_v23 }
 0x21f   :  { %v923_v37 = vadd.f32 %v911_v11, %v887_v22 }
 0x221   :  { %v980_v58 = vpop.permute.xlu2 %979  ;;  %v931_v52 = vpop.permute.xlu1 %930 }
 0x222   :  { %v992_v45 = vmul.f32 %v980_v58, %v968_v49  ;;  %v963_v35 = vsel %vm480_vm7, %v949_v10, %v931_v52  ;;  %v915_v49 = vmul.f32 %v2767_v59, %v3256_v53 }
 0x223   :  { %v969_v0 = vsel %vm83_vm6, %v963_v35, 0.0 }
 0x224   :  { %v993_v48 = vmul.f32 %v980_v58, %v969_v0  ;;  %v2816_v13 = vadd.f32 %v992_v45, %v920_v50  ;;  %v927_v35 = vadd.f32 %v915_v49, %v891_v31  ;;  %v917_v31 = vmul.f32 %v2767_v59, %v2345_v44 }
 0x226   :  { %v2819_v27 = vadd.f32 %v993_v48, %v2715_v36  ;;  %v929_v53 = vadd.f32 %v917_v31, %v2802_v5 }
 0x229   :  { %v937_v51 = vpop.permute.xlu1 %936  ;;  %v2830_v32 = vpop.permute.xlu2 %987 }
 0x22a   :  { %v957_v10 = vsel %vm480_vm7, %v937_v51, %v2697_v55  ;;  %v960_v61 = vsel %vm480_vm7, %v931_v52, %v937_v51  ;;  %v926_v52 = vadd.f32 %v914_v28, %v890_v18  ;;  %v912_v51 = vmul.f32 %v2683_v8, %v3257_v41  ;;  %v3258_v18 = vld [vmem:[#allocation46_spill] sm:$0xff] }
 0x22b   :  { %v966_v36 = vsel %vm80_vm8, %v960_v61, 0.0  ;;  %v967_v26 = vsel %vm81_vm15, %v957_v10, 0.0  ;;  %v913_v38 = vmul.f32 %v2683_v8, %v3258_v18 }
 0x22c   :  { %v990_v62 = vmul.f32 %v980_v58, %v966_v36  ;;  %v991_v12 = vmul.f32 %v980_v58, %v967_v26  ;;  %v3259_v36 = vld [vmem:[#allocation53_spill] sm:$0xff]  ;;  %v1024_v26 = vpop.permute.xlu0 %1023 }
 0x22d   :  { %v916_v14 = vmul.f32 %v2767_v59, %v3259_v36 }
 0x22e   :  { %v2838_v47 = vadd.f32 %v990_v62, %v918_v54  ;;  %v2840_v55 = vadd.f32 %v991_v12, %v919_v16  ;;  %v924_v16 = vadd.f32 %v912_v51, %v2788_v60  ;;  %v925_v12 = vadd.f32 %v913_v38, %v2791_v19 }
 0x22f   :  { %v52_v60 = vshra.s32 %v1865_v3, 8 }
 0x231   :  { %v945_v40 = vpop.permute.xlu1 %944  ;;  %vm2896_vm1 = vcmp.eq.s32.totalorder %v52_v60, 0  ;;  %vm2900_vm2 = vcmp.eq.s32.totalorder %v52_v60, 1 }
 0x232   :  { %v958_v29 = vsel %vm480_vm7, %v2742_v42, %v945_v40  ;;  %v1020_v15 = vpop.permute.xlu2 %1019 }
 0x233   :  { %v971_v2 = vsel %vm81_vm15, %v958_v29, 0.0  ;;  %v1030_v24 = vadd.f32 %v1020_v15, %v1006_v17 }
 0x234   :  { %v995_v1 = vmul.f32 %v2775_v25, %v971_v2  ;;  %v3260_v2 = vld [vmem:[#allocation30_spill] sm:$0xff] }
 0x235   :  { %v1042_v58 = vadd.f32 3.0, %v1030_v24 }
 0x236   :  { %v1007_v39 = vadd.f32 %v995_v1, %v923_v37  ;;  %v53_v37 = vshra.s32 %v3260_v2, 8 }
 0x237   :  { %v1054_v46 = vmax.f32 %v1042_v58, 0.0 }
 0x238   :  { %v1031_v34 = vadd.f32 %v1020_v15, %v1007_v39  ;;  %vm2914_vm10 = vcmp.eq.s32.totalorder %v53_v37, 1 }
 0x239   :  { %v941_v63 = vpop.permute.xlu1 %940  ;;  %v1066_v62 = vmin.f32 %v1054_v46, 6.0 }
 0x23a   :  { %v959_v42 = vsel %vm480_vm7, %v941_v63, %v2794_v33  ;;  %v962_v22 = vsel %vm480_vm7, %v2717_v30, %v941_v63  ;;  %v1043_v45 = vadd.f32 3.0, %v1031_v34  ;;  %v928_v63 = vadd.f32 %v916_v14, %v2800_v6 }
 0x23b   :  { %v974_v17 = vsel %vm80_vm8, %v962_v22, 0.0  ;;  %v975_v50 = vsel %vm81_vm15, %v959_v42, 0.0  ;;  %v1078_v23 = vmul.f32 %v1066_v62, %v1030_v24  ;;  %vm2906_vm8 = vcmp.eq.s32.totalorder %v53_v37, 0 }
 0x23c   :  { %v998_v0 = vmul.f32 %v2830_v32, %v974_v17  ;;  %v999_v48 = vmul.f32 %v2830_v32, %v975_v50  ;;  %v1055_v10 = vmax.f32 %v1043_v45, 0.0  ;;  %v3268_v50 = vld [vmem:[#allocation33_spill] sm:$0xff] }
 0x23d   :  { %v55_v45 = vshra.s32 %v3268_v50, 8 }
 0x23e   :  { %v1010_v57 = vadd.f32 %v998_v0, %v926_v52  ;;  %v1011_v9 = vadd.f32 %v999_v48, %v927_v35  ;;  %v1067_v11 = vmin.f32 %v1055_v10, 6.0  ;;  %v2918_v0 = vmul.f32 0.16666667, %v1078_v23 }
 0x240   :  { %v2887_v29 = vadd.f32 %v1024_v26, %v1010_v57  ;;  %v1079_v49 = vmul.f32 %v1067_v11, %v1031_v34  ;;  %v1110_v14 = vsel %vm2896_vm1, %v2918_v0, 0.0  ;;  %v1213_v31 = vsel %vm2900_vm2, %v2918_v0, 0.0 }
 0x241   :  { %v951_v61 = vpop.permute.xlu1 %950 }
 0x242   :  { %v955_v54 = vsel %vm480_vm7, %v945_v40, %v951_v61  ;;  %v964_v8 = vsel %vm480_vm7, %v951_v61, %v2719_v4  ;;  %v2889_v40 = vadd.f32 %v1024_v26, %v1011_v9  ;;  %v3261_v4 = vld [vmem:[#allocation32_spill] sm:$0xff]  ;;  %v2925_v9 = vmul.f32 0.16666667, %v1079_v49 }
 0x243   :  { %v972_v56 = vsel %vm82_vm5, %v955_v54, 0.0  ;;  %v973_v44 = vsel %vm83_vm6, %v964_v8, 0.0  ;;  %v54_v1 = vshra.s32 %v3261_v4, 8 }
 0x244   :  { %v996_v59 = vmul.f32 %v2775_v25, %v972_v56  ;;  %v997_v19 = vmul.f32 %v2775_v25, %v973_v44  ;;  %v1046_v25 = vadd.f32 3.0, %v2887_v29  ;;  %v1047_v52 = vadd.f32 3.0, %v2889_v40 }
 0x245   :  { %vm2931_vm13 = vcmp.eq.s32.totalorder %v54_v1, 0  ;;  %vm2944_vm15 = vcmp.eq.s32.totalorder %v54_v1, 1  ;;  %v1111_v62 = vsel %vm2906_vm8, %v2925_v9, 0.0 }
 0x246   :  { %v1008_v39 = vadd.f32 %v996_v59, %v924_v16  ;;  %v1009_v28 = vadd.f32 %v997_v19, %v925_v12  ;;  %v1058_v51 = vmax.f32 %v1046_v25, 0.0  ;;  %v1059_v10 = vmax.f32 %v1047_v52, 0.0 }
 0x247   :  { %v1214_v12 = vsel %vm2914_vm10, %v2925_v9, 0.0 }
 0x248   :  { %v1032_v42 = vadd.f32 %v1020_v15, %v1008_v39  ;;  %v1033_v24 = vadd.f32 %v1020_v15, %v1009_v28  ;;  %v1070_v8 = vmin.f32 %v1058_v51, 6.0  ;;  %v1071_v56 = vmin.f32 %v1059_v10, 6.0 }
 0x249   :  { %v953_v17 = vpop.permute.xlu1 %952 }
 0x24a   :  { %v1044_v5 = vadd.f32 3.0, %v1032_v42  ;;  %v956_v34 = vsel %vm480_vm7, %v2794_v33, %v953_v17  ;;  %v1045_v48 = vadd.f32 3.0, %v1033_v24  ;;  %v965_v15 = vsel %vm480_vm7, %v953_v17, %v2717_v30 }
 0x24b   :  { %v976_v57 = vsel %vm82_vm5, %v956_v34, 0.0  ;;  %v977_v33 = vsel %vm83_vm6, %v965_v15, 0.0  ;;  %vm2937_vm7 = vcmp.eq.s32.totalorder %v55_v45, 0  ;;  %v1082_v49 = vmul.f32 %v1070_v8, %v2887_v29 }
 0x24c   :  { %v1056_v46 = vmax.f32 %v1044_v5, 0.0  ;;  %v1000_v41 = vmul.f32 %v2830_v32, %v976_v57  ;;  %v1001_v18 = vmul.f32 %v2830_v32, %v977_v33  ;;  %v1057_v38 = vmax.f32 %v1045_v48, 0.0 }
 0x24d   :  { %vm2988_vm5 = vcmp.eq.s32.totalorder %v55_v45, 1  ;;  %vm1139_vm6 = vcmask 220312  }
 0x24e   :  { %v1068_v61 = vmin.f32 %v1056_v46, 6.0  ;;  %v1012_v36 = vadd.f32 %v1000_v41, %v928_v63  ;;  %v1013_v20 = vadd.f32 %v1001_v18, %v929_v53  ;;  %v1069_v30 = vmin.f32 %v1057_v38, 6.0 }
 0x24f   :  { %v1226_v41 = vadd.f32 %v1214_v12, %v1213_v31 }
 0x250   :  { %v1036_v16 = vadd.f32 %v1024_v26, %v1012_v36  ;;  %v1080_v54 = vmul.f32 %v1068_v61, %v1032_v42  ;;  %v1037_v11 = vadd.f32 %v1024_v26, %v1013_v20  ;;  %v1081_v59 = vmul.f32 %v1069_v30, %v1033_v24 }
 0x251   :  { %v1016_v44 = vpop.permute.xlu1 %1015  ;;  %v1083_v24 = vmul.f32 %v1071_v56, %v2889_v40  ;;  %v2976_v61 = vmul.f32 0.16666667, %v1082_v49 }
 0x252   :  { %v1048_v60 = vadd.f32 3.0, %v1036_v16  ;;  %v1026_v19 = vadd.f32 %v1016_v44, %v2838_v47  ;;  %v1027_v2 = vadd.f32 %v1016_v44, %v2840_v55  ;;  %v1028_v37 = vadd.f32 %v1016_v44, %v2816_v13 }
 0x253   :  { %v1049_v4 = vadd.f32 3.0, %v1037_v11  ;;  %v1029_v1 = vadd.f32 %v1016_v44, %v2819_v27  ;;  %v2961_v39 = vmul.f32 0.16666667, %v1080_v54  ;;  %v2963_v23 = vmul.f32 0.16666667, %v1081_v59 }
 0x254   :  { %v1060_v28 = vmax.f32 %v1048_v60, 0.0  ;;  %v1038_v63 = vadd.f32 3.0, %v1026_v19  ;;  %v1039_v53 = vadd.f32 3.0, %v1027_v2  ;;  %v1040_v26 = vadd.f32 3.0, %v1028_v37 }
 0x255   :  { %v1041_v42 = vadd.f32 3.0, %v1029_v1  ;;  %v1112_v47 = vsel %vm2931_vm13, %v2961_v39, 0.0  ;;  %v1123_v55 = vadd.f32 %v1111_v62, %v1110_v14  ;;  %v1113_v5 = vsel %vm2937_vm7, %v2963_v23, 0.0 }
 0x256   :  { %v1072_v13 = vmin.f32 %v1060_v28, 6.0  ;;  %v1050_v25 = vmax.f32 %v1038_v63, 0.0  ;;  %v1051_v52 = vmax.f32 %v1039_v53, 0.0  ;;  %v1052_v27 = vmax.f32 %v1040_v26, 0.0 }
 0x257   :  { %v1053_v17 = vmax.f32 %v1041_v42, 0.0  ;;  %v1124_v34 = vadd.f32 %v1123_v55, %v1112_v47  ;;  %v1061_v57 = vmax.f32 %v1049_v4, 0.0  ;;  %v1215_v40 = vsel %vm2944_vm15, %v2961_v39, 0.0 }
 0x258   :  { %v1062_v48 = vmin.f32 %v1050_v25, 6.0  ;;  %v1063_v29 = vmin.f32 %v1051_v52, 6.0  ;;  %v1064_v15 = vmin.f32 %v1052_v27, 6.0  ;;  %v1084_v51 = vmul.f32 %v1072_v13, %v1036_v16 }
 0x259   :  { %v1065_v46 = vmin.f32 %v1053_v17, 6.0  ;;  %v1125_v33 = vadd.f32 %v1124_v34, %v1113_v5  ;;  %v2978_v36 = vmul.f32 0.16666667, %v1083_v24  ;;  %v1073_v30 = vmin.f32 %v1061_v57, 6.0 }
 0x25a   :  { %v1074_v10 = vmul.f32 %v1062_v48, %v1026_v19  ;;  %v1075_v18 = vmul.f32 %v1063_v29, %v1027_v2  ;;  %v1076_v38 = vmul.f32 %v1064_v15, %v1028_v37  ;;  %v1227_v62 = vadd.f32 %v1226_v41, %v1215_v40  ;;  %v45_v29 = vld [vmem:[#allocation5] sm:$0x1] }
 0x25b   :  { %1126 = vadd.xlane.f32.xlu2 %v1125_v33  ;;  %v1077_v20 = vmul.f32 %v1065_v46, %v1029_v1  ;;  %v2992_v12 = vmul.f32 0.16666667, %v1084_v51  ;;  %v1217_v60 = vsel %vm2900_vm2, %v2976_v61, 0.0  ;;  %v1218_v19 = vsel %vm2914_vm10, %v2978_v36, 0.0 }
 0x25c   :  { %v2980_v14 = vmul.f32 0.16666667, %v1074_v10  ;;  %v2982_v54 = vmul.f32 0.16666667, %v1075_v18  ;;  %v2984_v31 = vmul.f32 0.16666667, %v1076_v38  ;;  %v1085_v1 = vmul.f32 %v1073_v30, %v1037_v11 }
 0x25d   :  { %v2994_v8 = vmul.f32 0.16666667, %v1077_v20  ;;  %v1216_v2 = vsel %vm2988_vm5, %v2963_v23, 0.0  ;;  %v1219_v26 = vsel %vm2944_vm15, %v2992_v12, 0.0  ;;  %v1114_v49 = vsel %vm2896_vm1, %v2976_v61, 0.0 }
 0x25e   :  { %v1209_v56 = vsel %vm2900_vm2, %v2980_v14, 0.0  ;;  %v1210_v44 = vsel %vm2914_vm10, %v2982_v54, 0.0  ;;  %v1106_v50 = vsel %vm2896_vm1, %v2980_v14, 0.0  ;;  %v1107_v59 = vsel %vm2906_vm8, %v2982_v54, 0.0 }
 0x25f   :  { %v1221_v45 = vadd.f32 %v1210_v44, %v1209_v56  ;;  %v1211_v37 = vsel %vm2944_vm15, %v2984_v31, 0.0  ;;  %v1118_v4 = vadd.f32 %v1107_v59, %v1106_v50  ;;  %v1228_v28 = vadd.f32 %v1227_v62, %v1216_v2  ;;  %v3279_v50 = vld [vmem:[#allocation54_spill] sm:$0xff] }
 0x260   :  { %v1108_v58 = vsel %vm2931_vm13, %v2984_v31, 0.0  ;;  %v1212_v35 = vsel %vm2988_vm5, %v2994_v8, 0.0  ;;  %v1109_v42 = vsel %vm2937_vm7, %v2994_v8, 0.0  ;;  %v1231_v47 = vadd.f32 %v1218_v19, %v1217_v60 }
 0x261   :  { %v1222_v63 = vadd.f32 %v1221_v45, %v1211_v37  ;;  %v1119_v53 = vadd.f32 %v1118_v4, %v1108_v58  ;;  %v1115_v55 = vsel %vm2906_vm8, %v2978_v36, 0.0  ;;  %v3038_v25 = vmul.f32 0.16666667, %v1085_v1 }
 0x262   :  { %v1232_v32 = vadd.f32 %v1231_v47, %v1219_v26  ;;  %v1116_v52 = vsel %vm2931_vm13, %v2992_v12, 0.0  ;;  %v1128_v27 = vadd.f32 %v1115_v55, %v1114_v49 }
 0x263   :  { %1229 = vadd.xlane.f32.xlu2 %v1228_v28  ;;  %v1223_v11 = vadd.f32 %v1222_v63, %v1212_v35  ;;  %v1120_v13 = vadd.f32 %v1119_v53, %v1109_v42  ;;  %v1220_v24 = vsel %vm2988_vm5, %v3038_v25, 0.0  ;;  %v1117_v34 = vsel %vm2937_vm7, %v3038_v25, 0.0 }
 0x264   :  { %v1129_v17 = vadd.f32 %v1128_v27, %v1116_v52  ;;  %v1233_v5 = vadd.f32 %v1232_v32, %v1220_v24 }
 0x265   :  { %1224 = vadd.xlane.f32.xlu0 %v1223_v11  ;;  %1121 = vadd.xlane.f32.xlu1 %v1120_v13 }
 0x266   :  { %v1130_v48 = vadd.f32 %v1129_v17, %v1117_v34 }
 0x26b   :  { %1234 = vadd.xlane.f32.xlu2 %v1233_v5 }
 0x26d   :  { %1131 = vadd.xlane.f32.xlu1 %v1130_v48 }
 0x286   :  { %1152 = vrot.lane.b32.xlu1 %v45_v29, %s1646_s23 }
 0x2ce   :  { %v1127_v15 = vpop.xlane.xlu2 %1126 }
 0x2cf   :  { %v1134_v38 = vmul.f32 0.00390625, %v1127_v15 }
 0x2d1   :  { %v1137_v56 = vmul.f32 %v2584_v21, %v1134_v38 }
 0x2d3   :  { %v1141_v4 = vsel %vm1139_vm6, %v1137_v56, 0.0 }
 0x2d6   :  { %v1230_v57 = vpop.xlane.xlu2 %1229 }
 0x2d7   :  { %v1237_v33 = vmul.f32 0.00390625, %v1230_v57 }
 0x2d8   :  { %v1225_v46 = vpop.xlane.xlu0 %1224  ;;  %v1122_v51 = vpop.xlane.xlu1 %1121 }
 0x2d9   :  { %v1236_v41 = vmul.f32 0.00390625, %v1225_v46  ;;  %v1133_v10 = vmul.f32 0.00390625, %v1122_v51  ;;  %v1240_v40 = vmul.f32 %v2584_v21, %v1237_v33 }
 0x2db   :  { %v1239_v18 = vmul.f32 %v2524_v7, %v1236_v41  ;;  %v1136_v20 = vmul.f32 %v2524_v7, %v1133_v10  ;;  %v1243_v44 = vsel %vm1139_vm6, %v1240_v40, 0.0 }
 0x2dd   :  { %v1242_v16 = vsel %vm1139_vm6, %v1239_v18, 0.0  ;;  %v1140_v19 = vsel %vm1139_vm6, %v1136_v20, 0.0 }
 0x2de   :  { %v1235_v30 = vpop.xlane.xlu2 %1234  ;;  %v1244_v60 = vadd.f32 %v1243_v44, %v1242_v16  ;;  %v1142_v63 = vadd.f32 %v1141_v4, %v1140_v19 }
 0x2df   :  { %v1238_v62 = vmul.f32 0.00390625, %v1235_v30 }
 0x2e0   :  { %v1132_v59 = vpop.xlane.xlu1 %1131 }
 0x2e1   :  { %v1241_v45 = vmul.f32 %v3279_v50, %v1238_v62  ;;  %v1135_v2 = vmul.f32 0.00390625, %v1132_v59 }
 0x2e3   :  { %v1245_v37 = vsel %vm1139_vm6, %v1241_v45, 0.0  ;;  %v1138_v28 = vmul.f32 %v3279_v50, %v1135_v2 }
 0x2e4   :  { %v1246_v1 = vadd.f32 %v1245_v37, %v1244_v60  ;;  %v1648_v37 = vmov 43  }
 0x2e5   :  { %v1143_v35 = vsel %vm1139_vm6, %v1138_v28, 0.0  ;;  %1537 = vset.pattern.permute.xlu2 %v1648_v37  ;;  %1535 = vset.pattern.permute.xlu1 %v1648_v37 }
 0x2e6   :  { %v1247_v58 = vrot.slane %v1246_v1, 4  ;;  %v1144_v53 = vadd.f32 %v1143_v35, %v1142_v63  ;;  %1536 = vset.pattern.permute.xlu0 %v1648_v37 }
 0x2e8   :  { %v1248_v26 = vadd.f32 %v1247_v58, %v1246_v1  ;;  %v1145_v49 = vrot.slane %v1144_v53, 4 }
 0x2ea   :  { %v1146_v11 = vadd.f32 %v1145_v49, %v1144_v53  ;;  %v1249_v42 = vrot.slane %v1248_v26, 2 }
 0x2ec   :  { %v1147_v47 = vrot.slane %v1146_v11, 2  ;;  %v1250_v13 = vadd.f32 %v1249_v42, %v1248_v26  ;;  %v1543_v26 = vld [vmem:[#allocation5 + $0x10] sm:$0xff] }
 0x2ee   :  { %v1148_v55 = vadd.f32 %v1147_v47, %v1146_v11  ;;  %v1251_v52 = vrot.slane %v1250_v13, 1 }
 0x2f0   :  { %v1149_v32 = vrot.slane %v1148_v55, 1  ;;  %v1252_v24 = vadd.f32 %v1251_v52, %v1250_v13 }
 0x2f2   :  { %v1150_v27 = vadd.f32 %v1149_v32, %v1148_v55 }
 0x2f8   :  { %v1153_v17 = vpop.permute.xlu1 %1152 }
 0x2f9   :  { %v1155_v5 = vadd.f32 %v1153_v17, %v1150_v27  ;;  %v1253_v34 = vadd.f32 %v1252_v24, %v1153_v17 }
 0x2fb   :  { %v1156_v48 = vmax.f32 %v1155_v5, 0.0  ;;  %v1254_v29 = vmax.f32 %v1253_v34, 0.0 }
 0x2fd   :  { %v1157_v15 = vperm.slane %v1156_v48, 0  ;;  %v1255_v57 = vperm.slane %v1254_v29, 0 }
 0x2ff   :  { %1159 = vrot.lane.b32.xlu2 %v1157_v15, %s1638_s1  ;;  %1257 = vrot.lane.b32.xlu0 %v1255_v57, %s1638_s1 }
 0x359   :  { %v1160_v46 = vpop.permute.xlu2 %1159 }
 0x35a   :  { %v1163_v33 = vmul.f32 %v2584_v21, %v1160_v46  ;;  %v1164_v41 = vmul.f32 %v3279_v50, %v1160_v46  ;;  %v1162_v40 = vmul.f32 %v2524_v7, %v1160_v46 }
 0x35c   :  { %1172 = vrot.lane.b32.xlu1 %v1164_v41, %s1647_s24  ;;  %1170 = vrot.lane.b32.xlu2 %v1163_v33, %s1647_s24 }
 0x371   :  { %v1258_v51 = vpop.permute.xlu0 %1257 }
 0x372   :  { %v1260_v10 = vmul.f32 %v2524_v7, %v1258_v51  ;;  %v1261_v18 = vmul.f32 %v2584_v21, %v1258_v51  ;;  %v1262_v38 = vmul.f32 %v3279_v50, %v1258_v51 }
 0x374   :  { %1270 = vrot.lane.b32.xlu0 %v1262_v38, %s1647_s24  ;;  %1268 = vrot.lane.b32.xlu1 %v1261_v18, %s1647_s24  ;;  %v1544_v18 = vld [vmem:[#allocation5] sm:$0xff] }
 0x375   :  { %1266 = vrot.lane.b32.xlu2 %v1260_v10, %s1647_s24 }
 0x37c   :  { %1168 = vrot.lane.b32.xlu0 %v1162_v40, %s1647_s24 }
 0x3b6   :  { %v1171_v20 = vpop.permute.xlu2 %1170 }
 0x3b7   :  { %v1180_v30 = vsel %vm3280_vm9, %v1171_v20, 0.0 }
 0x3b8   :  { %1181 = vadd.xlane.f32.xlu2 %v1180_v30 }
 0x3ce   :  { %v1173_v16 = vpop.permute.xlu1 %1172 }
 0x3cf   :  { %v1183_v62 = vsel %vm3281_vm3, %v1173_v16, 0.0  ;;  %v1267_v56 = vpop.permute.xlu2 %1266 }
 0x3d0   :  { %v1275_v44 = vsel %vm3282_vm4, %v1267_v56, 0.0  ;;  %1184 = vadd.xlane.f32.xlu1 %v1183_v62  ;;  %v46_v62 = vld [vmem:[#allocation5] sm:$0xff]  ;;  %v1650_v56 = vmov 68  }
 0x3d1   :  { %1276 = vadd.xlane.f32.xlu2 %v1275_v44 }
 0x3e6   :  { %v1271_v45 = vpop.permute.xlu0 %1270  ;;  %v1269_v50 = vpop.permute.xlu1 %1268 }
 0x3e7   :  { %v1278_v59 = vsel %vm3283_vm11, %v1269_v50, 0.0  ;;  %v1281_v60 = vsel %vm3284_vm12, %v1271_v45, 0.0 }
 0x3e8   :  { %1282 = vadd.xlane.f32.xlu0 %v1281_v60  ;;  %1279 = vadd.xlane.f32.xlu1 %v1278_v59 }
 0x3ee   :  { %v1169_v19 = vpop.permute.xlu0 %1168 }
 0x3ef   :  { %v1177_v2 = vsel %vm3285_vm14, %v1169_v19, 0.0 }
 0x3f0   :  { %1178 = vadd.xlane.f32.xlu0 %v1177_v2 }
 0x42b   :  { %v1182_v4 = vpop.xlane.xlu2 %1181 }
 0x42c   :  { %v1187_v1 = vadd.f32 %v2584_v21, %v1182_v4 }
 0x42e   :  { %v1190_v28 = vadd.f32 3.0, %v1187_v1 }
 0x430   :  { %v1193_v63 = vmax.f32 %v1190_v28, 0.0 }
 0x432   :  { %v1196_v58 = vmin.f32 %v1193_v63, 6.0 }
 0x434   :  { %v1199_v35 = vmul.f32 0.16666667, %v1196_v58 }
 0x436   :  { %1306 = vperm.xlu2 %1537, %v1199_v35  }
 0x443   :  { %v1185_v53 = vpop.xlane.xlu1 %1184 }
 0x444   :  { %v1188_v49 = vadd.f32 %v1543_v26, %v1185_v53  ;;  %v1277_v13 = vpop.xlane.xlu2 %1276 }
 0x445   :  { %v1284_v27 = vadd.f32 %v2524_v7, %v1277_v13 }
 0x446   :  { %v1191_v11 = vadd.f32 3.0, %v1188_v49 }
 0x447   :  { %v1287_v48 = vadd.f32 3.0, %v1284_v27 }
 0x448   :  { %v1194_v42 = vmax.f32 %v1191_v11, 0.0 }
 0x449   :  { %v1290_v41 = vmax.f32 %v1287_v48, 0.0 }
 0x44a   :  { %v1197_v47 = vmin.f32 %v1194_v42, 6.0 }
 0x44b   :  { %v1293_v7 = vmin.f32 %v1290_v41, 6.0 }
 0x44c   :  { %v1200_v55 = vmul.f32 0.16666667, %v1197_v47 }
 0x44e   :  { %1311 = vperm.xlu1 %1535, %v1200_v55  }
 0x45b   :  { %v1283_v32 = vpop.xlane.xlu0 %1282  ;;  %v1280_v52 = vpop.xlane.xlu1 %1279 }
 0x45c   :  { %v1286_v24 = vadd.f32 %v1543_v26, %v1283_v32  ;;  %v1285_v17 = vadd.f32 %v2584_v21, %v1280_v52  ;;  %v1296_v21 = vmul.f32 0.16666667, %v1293_v7 }
 0x45e   :  { %v1289_v5 = vadd.f32 3.0, %v1286_v24  ;;  %v1288_v34 = vadd.f32 3.0, %v1285_v17 }
 0x460   :  { %v1292_v29 = vmax.f32 %v1289_v5, 0.0  ;;  %v1291_v15 = vmax.f32 %v1288_v34, 0.0  ;;  %v1547_v34 = vld [vmem:[#allocation2 + $0x10] sm:$0xff] }
 0x462   :  { %v1295_v57 = vmin.f32 %v1292_v29, 6.0  ;;  %v1294_v46 = vmin.f32 %v1291_v15, 6.0  ;;  %v1548_v29 = vld [vmem:[#allocation2 + $0x18] sm:$0xff] }
 0x463   :  { %v1179_v33 = vpop.xlane.xlu0 %1178 }
 0x464   :  { %v1298_v51 = vmul.f32 0.16666667, %v1295_v57  ;;  %v1297_v10 = vmul.f32 0.16666667, %v1294_v46  ;;  %v1186_v38 = vadd.f32 %v1544_v18, %v1179_v33 }
 0x466   :  { %v1189_v40 = vadd.f32 3.0, %v1186_v38  ;;  %1326 = vperm.xlu0 %1536, %v1298_v51   ;;  %1321 = vperm.xlu1 %1535, %v1297_v10  }
 0x468   :  { %v1192_v20 = vmax.f32 %v1189_v40, 0.0 }
 0x46a   :  { %v1195_v30 = vmin.f32 %v1192_v20, 6.0 }
 0x46c   :  { %v1198_v16 = vmul.f32 0.16666667, %v1195_v30 }
 0x46e   :  { %1301 = vperm.xlu2 %1537, %v1198_v16   ;;  %1316 = vperm.xlu1 %1535, %v1296_v21  }
 0x46f   :  { %1539 = vset.pattern.permute.xlu0 %v1650_v56 }
 0x476   :  { %1358 = vrot.lane.b32.xlu2 %v46_v62, %s1649_s25  ;;  %1538 = vset.pattern.permute.xlu1 %v1650_v56 }
 0x477   :  { %1355 = vperm.xlu1 %1538, %v46_v62  }
 0x490   :  { %v1307_v45 = vpop.permute.xlu2 %1306 }
 0x4c0   :  { %v1312_v44 = vpop.permute.xlu1 %1311 }
 0x4c8   :  { %v1302_v58 = vpop.permute.xlu2 %1301 }
 0x4d0   :  { %v1359_v32 = vpop.permute.xlu2 %1358 }
 0x4d8   :  { %v1327_v50 = vpop.permute.xlu0 %1326  ;;  %v1322_v59 = vpop.permute.xlu1 %1321 }
 0x4d9   :  { %v1337_v60 = vsel %vm2896_vm1, %v1312_v44, %v1327_v50  ;;  %v1338_v19 = vsel %vm2906_vm8, %v1312_v44, %v1327_v50  ;;  %v1339_v2 = vsel %vm2931_vm13, %v1312_v44, %v1327_v50  ;;  %v1340_v37 = vsel %vm2937_vm7, %v1312_v44, %v1327_v50 }
 0x4da   :  { %v1349_v4 = vmul.f32 %v1337_v60, %v2976_v61  ;;  %v1350_v1 = vmul.f32 %v1338_v19, %v2978_v36  ;;  %v1351_v28 = vmul.f32 %v1339_v2, %v2992_v12  ;;  %v1352_v63 = vmul.f32 %v1340_v37, %v3038_v25 }
 0x4db   :  { %v1333_v35 = vsel %vm2896_vm1, %v1307_v45, %v1322_v59  ;;  %v1334_v53 = vsel %vm2906_vm8, %v1307_v45, %v1322_v59  ;;  %v1335_v26 = vsel %vm2931_vm13, %v1307_v45, %v1322_v59  ;;  %v1336_v49 = vsel %vm2937_vm7, %v1307_v45, %v1322_v59 }
 0x4dc   :  { %1376 = vmatpush.msrb.mxu0 %v1349_v4  ;;  %1396 = vmatpush.msrb.mxu1 %v1350_v1  ;;  %v1345_v61 = vmul.f32 %v1333_v35, %v2918_v0  ;;  %v1346_v36 = vmul.f32 %v1334_v53, %v2925_v9  ;;  %v1347_v12 = vmul.f32 %v1335_v26, %v2961_v39 }
 0x4dd   :  { %1416 = vmatpush.msrb.mxu2 %v1351_v28  ;;  %1436 = vmatpush.msrb.mxu3 %v1352_v63  ;;  %v1348_v25 = vmul.f32 %v1336_v49, %v2963_v23 }
 0x4de   :  { %1377 = vmatpush.msrb.mxu0 %v1345_v61  ;;  %1397 = vmatpush.msrb.mxu1 %v1346_v36 }
 0x4df   :  { %1417 = vmatpush.msrb.mxu2 %v1347_v12  ;;  %1437 = vmatpush.msrb.mxu3 %v1348_v25 }
 0x4e0   :  { %v1317_v11 = vpop.permute.xlu1 %1316 }
 0x4e1   :  { %v1329_v42 = vsel %vm2896_vm1, %v1302_v58, %v1317_v11  ;;  %v1330_v47 = vsel %vm2906_vm8, %v1302_v58, %v1317_v11  ;;  %v1331_v0 = vsel %vm2931_vm13, %v1302_v58, %v1317_v11  ;;  %v1332_v9 = vsel %vm2937_vm7, %v1302_v58, %v1317_v11 }
 0x4e2   :  { %v1341_v39 = vmul.f32 %v1329_v42, %v2980_v14  ;;  %v1342_v23 = vmul.f32 %v1330_v47, %v2982_v54  ;;  %v1343_v55 = vmul.f32 %v1331_v0, %v2984_v31  ;;  %v1344_v13 = vmul.f32 %v1332_v9, %v2994_v8  ;;  %v1545_v54 = vld [vmem:[#allocation2] sm:$0xff]  ;;  %v1546_v31 = vld [vmem:[#allocation2 + $0x8] sm:$0xff] }
 0x4e4   :  { %1378 = vmatpush.msrb.mxu0 %v1341_v39  ;;  %1398 = vmatpush.msrb.mxu1 %v1342_v23 }
 0x4e5   :  { %1418 = vmatpush.msrb.mxu2 %v1343_v55  ;;  %1438 = vmatpush.msrb.mxu3 %v1344_v13 }
 0x4e6   :  { %1481 = vmatmul.msk.f32.vlgmr.msrb.gmra.mxu0 %vm1360_vm0, %v1359_v32  ;;  %1482 = vmatmul.msk.f32.vlgmr.msrb.gmra.mxu1 %vm1360_vm0, %v1359_v32 }
 0x4e7   :  { %1483 = vmatmul.msk.f32.vlgmr.msrb.gmra.mxu2 %vm1360_vm0, %v1359_v32  ;;  %1484 = vmatmul.msk.f32.vlgmr.msrb.gmra.mxu3 %vm1360_vm0, %v1359_v32 }
 0x4e9   :  { %v1356_v22 = vpop.permute.xlu1 %1355 }
 0x563   :  { %v1380_v6 = vpop.f32.mrf.mxu0  ;;  %v1400_v3 = vpop.f32.mrf.mxu1 }
 0x564   :  { %v1381_v43 = vadd.f32 %v1380_v6, %v1356_v22  ;;  %v1401_v14 = vadd.f32 %v1400_v3, %v1356_v22 }
 0x566   :  { %v1443_v52 = vadd.f32 %v1545_v54, %v1381_v43  ;;  %v1444_v27 = vadd.f32 %v1546_v31, %v1401_v14 }
 0x568   :  { %1447 = vst [vmem:[#allocation7] sm:$0xff] %v1443_v52 }
 0x569   :  { %1448 = vst [vmem:[#allocation7 + $0x8] sm:$0xff] %v1444_v27 }
 0x56a   :  { %v1420_v8 = vpop.f32.mrf.mxu2  ;;  %v1440_v24 = vpop.f32.mrf.mxu3 }
 0x56b   :  { %v1421_v17 = vadd.f32 %v1420_v8, %v1356_v22  ;;  %v1441_v5 = vadd.f32 %v1440_v24, %v1356_v22 }
 0x56d   :  { %v1445_v48 = vadd.f32 %v1547_v34, %v1421_v17  ;;  %v1446_v15 = vadd.f32 %v1548_v29, %v1441_v5 }
 0x56f   :  { %1449 = vst [vmem:[#allocation7 + $0x10] sm:$0xff] %v1445_v48 }
 0x570   :  { %1450 = vst [vmem:[#allocation7 + $0x18] sm:$0xff] %v1446_v15 }
 0x571   :  { %1461 = dma.vmem_to_hbm [thread:$0]  %s1457_s27, 512, %s1459_s30, [#allocation4]  }
 0x572   :  { %1625 = dma.done.wait [#allocation4], 512  }
 0x573   :  { %1626 = vsyncadd [#allocation4], 4294966784 }
 0x574   :  { %1466 = vsyncpa [#allocation3], 1 }
 0x575   :  { %1467 = vsyncpa [#allocation6], 1 }
 0x576   :  { %1468 = vsyncpa [#allocation4], 1 }

</bundles_post_ra>
